<compile_context>
chip_gen: v7x
topology: tpu7x:2x2x1
jax: 0.10.0
libtpu: 0.0.40
codegen_flags: <defaults>
</compile_context>

<pallas_src>
import functools
import math
from math import sqrt

import jax
import jax.numpy as jnp
from jax import lax
from jax.experimental import pallas as pl
from jax.experimental.pallas import tpu as pltpu

LANE = 128            # lane width: pad every feature dim to a multiple of this
NEG_BIG = -1e30       # finite "-inf" for masked keys (avoids inf-inf -> NaN)

# fused single-launch path
FUSED_VMEM_BUDGET = 20 * 1024 * 1024   # use the fused path below this estimate
VMEM_LIMIT_BYTES = 40 * 1024 * 1024    # scoped-VMEM limit (safe on v5e/v6e/v7x)

# multi-call (large-N) path tiles
SMALL_ROWS = 256      # below this, a single row tile per kernel
TM_GEMM = 512         # row tile for pure-GEMM kernels (~85% of HBM roofline)
TM_QKV = 512          # row tile over the stacked 3*Np axis for QKV projection
TQ_ATTN = 256         # Q-row tile for flash attention
TK_ATTN = 512         # key-chunk size for flash attention


def _rup(x, m):
    return ((x + m - 1) // m) * m


def _cp(dims):
    return pltpu.CompilerParams(dimension_semantics=dims,
                                vmem_limit_bytes=VMEM_LIMIT_BYTES)


# ----------------------------------------------------------------------------
# Fully fused single-launch kernel (transform + encoder + tail)
# ----------------------------------------------------------------------------
def _fused_forward_kernel(*refs, enc_layer, dec_layer, np_pad, enc_pdims,
                          enc_scales):
    h1_ref, h2_ref, h3_ref = refs[0], refs[1], refs[2]
    t1_w, t1_b, t2_w, t2_b, t3_w, t3_b = refs[3:9]
    bias_ref = refs[9]
    i = 10
    enc_refs = refs[i:i + 2 * enc_layer]; i += 2 * enc_layer
    lin_w_ref, lin_b_ref = refs[i], refs[i + 1]; i += 2
    dec2_refs = refs[i:i + 2 * dec_layer]; i += 2 * dec_layer
    dec3_refs = refs[i:i + 2 * dec_layer]; i += 2 * dec_layer
    hcat_ref, out2_ref, out3_ref = refs[i], refs[i + 1], refs[i + 2]

    def lin(x, w_ref, b_ref):
        return (jnp.dot(x, w_ref[...], preferred_element_type=jnp.float32)
                + b_ref[...])

    # transforms, stacked view-major: [view0 rows; view1 rows; view2 rows]
    H = jnp.concatenate([lin(h1_ref[...], t1_w, t1_b),
                         lin(h2_ref[...], t2_w, t2_b),
                         lin(h3_ref[...], t3_w, t3_b)], axis=0)
    bias = bias_ref[...]                      # (1, 3*Np): 0 valid, -1e30 padded

    # encoder: dense cross-view attention, all in VMEM
    for l in range(enc_layer):
        w_qkv, b_qkv = enc_refs[2 * l], enc_refs[2 * l + 1]
        pd = enc_pdims[l]
        y = (jnp.dot(H, w_qkv[...], preferred_element_type=jnp.float32)
             + b_qkv[...])
        q = y[:, :pd]
        k = y[:, pd:2 * pd]
        v = y[:, 2 * pd:3 * pd]
        s = lax.dot_general(q, k, (((1,), (1,)), ((), ())),
                            preferred_element_type=jnp.float32)
        s = s * enc_scales[l] + bias
        m = jnp.max(s, axis=-1, keepdims=True)
        p = jnp.exp(s - m)
        denom = jnp.sum(p, axis=-1, keepdims=True)
        H = jnp.dot(p, v, preferred_element_type=jnp.float32) / denom

    # tail: split views, emit lane-dense H_cat, lin+ReLU, two decoder chains
    H1e = H[:np_pad]
    H2e = H[np_pad:2 * np_pad]
    H3e = H[2 * np_pad:3 * np_pad]
    P = H1e.shape[-1]
    hcat_ref[:, :P] = H1e.astype(hcat_ref.dtype)
    hcat_ref[:, P:2 * P] = H2e.astype(hcat_ref.dtype)
    hcat_ref[:, 2 * P:] = H3e.astype(hcat_ref.dtype)

    acc = jnp.dot(H1e, lin_w_ref[0], preferred_element_type=jnp.float32)
    acc = acc + jnp.dot(H2e, lin_w_ref[1], preferred_element_type=jnp.float32)
    acc = acc + jnp.dot(H3e, lin_w_ref[2], preferred_element_type=jnp.float32)
    h = jnp.maximum(acc + lin_b_ref[...], 0.0)

    h2 = h
    for l in range(dec_layer):
        h2 = jnp.maximum(
            jnp.dot(h2, dec2_refs[2 * l][...],
                    preferred_element_type=jnp.float32)
            + dec2_refs[2 * l + 1][...], 0.0)
    out2_ref[...] = h2.astype(out2_ref.dtype)

    h3 = h
    for l in range(dec_layer):
        h3 = jnp.maximum(
            jnp.dot(h3, dec3_refs[2 * l][...],
                    preferred_element_type=jnp.float32)
            + dec3_refs[2 * l + 1][...], 0.0)
    out3_ref[...] = h3.astype(out3_ref.dtype)


def fused_forward(cfg, params, H1p, H2p, H3p, key_bias, Np):
    enc_pdims = tuple(_rup(d, LANE) for (_di, d) in cfg["enc_dims"])
    enc_scales = tuple(1.0 / sqrt(d) for (_di, d) in cfg["enc_dims"])
    pout = params["lin_w"].shape[1]
    ph2 = params["dec2"][-1][0].shape[1]
    ph3 = params["dec3"][-1][0].shape[1]

    args = [H1p, H2p, H3p,
            params["t1_w"], params["t1_b"],
            params["t2_w"], params["t2_b"],
            params["t3_w"], params["t3_b"],
            key_bias]
    for lp in params["encoder"]:
        args += [lp["w_qkv"], lp["b_qkv"]]
    args += [params["lin_w"], params["lin_b"]]
    for (w, b) in list(params["dec2"]) + list(params["dec3"]):
        args += [w, b]

    kernel = functools.partial(
        _fused_forward_kernel,
        enc_layer=cfg["enc_layer"], dec_layer=cfg["dec_layer"],
        np_pad=Np, enc_pdims=enc_pdims, enc_scales=enc_scales)

    # grid-less call: every input / output whole in VMEM, one launch
    return pl.pallas_call(
        kernel,
        out_shape=(jax.ShapeDtypeStruct((Np, 3 * pout), jnp.float32),
                   jax.ShapeDtypeStruct((Np, ph2), jnp.float32),
                   jax.ShapeDtypeStruct((Np, ph3), jnp.float32)),
        compiler_params=pltpu.CompilerParams(
            vmem_limit_bytes=VMEM_LIMIT_BYTES),
    )(*args)


def _fused_vmem_estimate(cfg, params, Np):
    """Conservative byte estimate of the fused kernel's VMEM working set."""
    M3 = 3 * Np
    pdims = [params["t1_w"].shape[1]] + [_rup(d, LANE)
                                         for (_di, d) in cfg["enc_dims"]]
    pmax = max(pdims)
    wbytes = sum(math.prod(a.shape) * 4
                 for a in jax.tree_util.tree_leaves(params))
    inbytes = 4 * Np * (params["t1_w"].shape[0] + params["t2_w"].shape[0]
                        + params["t3_w"].shape[0]) + 4 * M3
    act = 4 * M3 * pmax * 8          # y + q/k/v + H + attention output
    scores = 4 * M3 * M3 * 2         # s and p coexist
    pout = params["lin_w"].shape[1]
    ph2 = params["dec2"][-1][0].shape[1]
    ph3 = params["dec3"][-1][0].shape[1]
    tail = 4 * Np * (3 * pout + ph2 + ph3 + 2 * pout)
    return wbytes + inbytes + act + scores + tail


# ----------------------------------------------------------------------------
# Multi-call (large-N) kernels
# ----------------------------------------------------------------------------
def _transform_kernel(h1_ref, h2_ref, h3_ref, w1_ref, b1_ref, w2_ref, b2_ref,
                      w3_ref, b3_ref, o_ref):
    """Fused transform1/2/3: o[v] = H_v @ W_v + b_v, one launch."""
    def lin(h_ref, w_ref, b_ref):
        return (jnp.dot(h_ref[...], w_ref[...],
                        preferred_element_type=jnp.float32) + b_ref[...])
    o_ref[0] = lin(h1_ref, w1_ref, b1_ref).astype(o_ref.dtype)
    o_ref[1] = lin(h2_ref, w2_ref, b2_ref).astype(o_ref.dtype)
    o_ref[2] = lin(h3_ref, w3_ref, b3_ref).astype(o_ref.dtype)


def _qkv_kernel(h_ref, w_ref, b_ref, q_ref, k_ref, v_ref, *, dp_out):
    """Packed projection: one GEMM with W = [Wq|Wk|Wv], Q/K/V split outputs."""
    y = jnp.dot(h_ref[...], w_ref[...],
                preferred_element_type=jnp.float32) + b_ref[...]
    q_ref[...] = y[:, :dp_out].astype(q_ref.dtype)
    k_ref[...] = y[:, dp_out:2 * dp_out].astype(k_ref.dtype)
    v_ref[...] = y[:, 2 * dp_out:3 * dp_out].astype(v_ref.dtype)


def _attn_kernel(q_ref, k_ref, v_ref, bias_ref, o_ref, m_sc, l_sc, acc_sc, *,
                 scale):
    """Flash-style key-chunked online-softmax cross-view attention."""
    ki = pl.program_id(1)

    @pl.when(ki == 0)
    def _():
        m_sc[...] = jnp.full_like(m_sc, NEG_BIG)
        l_sc[...] = jnp.zeros_like(l_sc)
        acc_sc[...] = jnp.zeros_like(acc_sc)

    s = lax.dot_general(q_ref[...], k_ref[...], (((1,), (1,)), ((), ())),
                        preferred_element_type=jnp.float32)
    s = s * scale + bias_ref[...]
    m_new = jnp.maximum(m_sc[...], jnp.max(s, axis=-1, keepdims=True))
    alpha = jnp.exp(m_sc[...] - m_new)
    p = jnp.exp(s - m_new)
    l_sc[...] = alpha * l_sc[...] + jnp.sum(p, axis=-1, keepdims=True)
    acc_sc[...] = alpha * acc_sc[...] + jnp.dot(
        p, v_ref[...], preferred_element_type=jnp.float32)
    m_sc[...] = m_new

    @pl.when(ki == pl.num_programs(1) - 1)
    def _():
        o_ref[...] = (acc_sc[...] / l_sc[...]).astype(o_ref.dtype)


def _tail_kernel(*refs, dec_layer):
    """Fused tail: lane-dense H_cat, lin+ReLU, the two decoder MLP chains."""
    h_ref, wlin_ref, blin_ref = refs[0], refs[1], refs[2]
    n_in = 3 + 4 * dec_layer
    dec_refs = refs[3:n_in]
    hcat_ref, out2_ref, out3_ref = refs[n_in], refs[n_in + 1], refs[n_in + 2]
    dec2 = [(dec_refs[2 * i], dec_refs[2 * i + 1]) for i in range(dec_layer)]
    dec3 = [(dec_refs[2 * dec_layer + 2 * i], dec_refs[2 * dec_layer + 2 * i + 1])
            for i in range(dec_layer)]

    P = h_ref.shape[-1]
    h0, h1v, h2v = h_ref[0], h_ref[1], h_ref[2]
    hcat_ref[:, :P] = h0.astype(hcat_ref.dtype)
    hcat_ref[:, P:2 * P] = h1v.astype(hcat_ref.dtype)
    hcat_ref[:, 2 * P:] = h2v.astype(hcat_ref.dtype)

    acc = jnp.dot(h0, wlin_ref[0], preferred_element_type=jnp.float32)
    acc = acc + jnp.dot(h1v, wlin_ref[1], preferred_element_type=jnp.float32)
    acc = acc + jnp.dot(h2v, wlin_ref[2], preferred_element_type=jnp.float32)
    h = jnp.maximum(acc + blin_ref[...], 0.0)

    h2 = h
    for (w_ref, b_ref) in dec2:
        h2 = jnp.maximum(
            jnp.dot(h2, w_ref[...], preferred_element_type=jnp.float32)
            + b_ref[...], 0.0)
    out2_ref[...] = h2.astype(out2_ref.dtype)

    h3 = h
    for (w_ref, b_ref) in dec3:
        h3 = jnp.maximum(
            jnp.dot(h3, w_ref[...], preferred_element_type=jnp.float32)
            + b_ref[...], 0.0)
    out3_ref[...] = h3.astype(out3_ref.dtype)


# ----------------------------------------------------------------------------
# Multi-call pallas_call wrappers
# ----------------------------------------------------------------------------
def fused_transform(H1p, H2p, H3p, w1, b1, w2, b2, w3, b3, tm):
    Np = H1p.shape[0]
    dp_in = w1.shape[1]
    return pl.pallas_call(
        _transform_kernel,
        out_shape=jax.ShapeDtypeStruct((3, Np, dp_in), H1p.dtype),
        grid=(Np // tm,),
        in_specs=[
            pl.BlockSpec((tm, H1p.shape[1]), lambda i: (i, 0)),
            pl.BlockSpec((tm, H2p.shape[1]), lambda i: (i, 0)),
            pl.BlockSpec((tm, H3p.shape[1]), lambda i: (i, 0)),
            pl.BlockSpec(w1.shape, lambda i: (0, 0)),
            pl.BlockSpec(b1.shape, lambda i: (0, 0)),
            pl.BlockSpec(w2.shape, lambda i: (0, 0)),
            pl.BlockSpec(b2.shape, lambda i: (0, 0)),
            pl.BlockSpec(w3.shape, lambda i: (0, 0)),
            pl.BlockSpec(b3.shape, lambda i: (0, 0)),
        ],
        out_specs=pl.BlockSpec((3, tm, dp_in), lambda i: (0, i, 0)),
        compiler_params=_cp(("parallel",)),
    )(H1p, H2p, H3p, w1, b1, w2, b2, w3, b3)


def qkv_project(H_all, w_qkv, b_qkv, tm):
    M, dp_in = H_all.shape
    dp3 = w_qkv.shape[1]
    dp = dp3 // 3
    kernel = functools.partial(_qkv_kernel, dp_out=dp)
    return pl.pallas_call(
        kernel,
        out_shape=(jax.ShapeDtypeStruct((M, dp), H_all.dtype),
                   jax.ShapeDtypeStruct((M, dp), H_all.dtype),
                   jax.ShapeDtypeStruct((M, dp), H_all.dtype)),
        grid=(M // tm,),
        in_specs=[
            pl.BlockSpec((tm, dp_in), lambda i: (i, 0)),
            pl.BlockSpec((dp_in, dp3), lambda i: (0, 0)),
            pl.BlockSpec((1, dp3), lambda i: (0, 0)),
        ],
        out_specs=(pl.BlockSpec((tm, dp), lambda i: (i, 0)),
                   pl.BlockSpec((tm, dp), lambda i: (i, 0)),
                   pl.BlockSpec((tm, dp), lambda i: (i, 0))),
        compiler_params=_cp(("parallel",)),
    )(H_all, w_qkv, b_qkv)


def cross_attention(Q, K, V, key_bias, *, scale, tq, tk):
    M, dp = Q.shape
    Mk = K.shape[0]
    kernel = functools.partial(_attn_kernel, scale=scale)
    return pl.pallas_call(
        kernel,
        out_shape=jax.ShapeDtypeStruct((M, dp), Q.dtype),
        grid=(M // tq, Mk // tk),
        in_specs=[
            pl.BlockSpec((tq, dp), lambda qi, ki: (qi, 0)),
            pl.BlockSpec((tk, dp), lambda qi, ki: (ki, 0)),
            pl.BlockSpec((tk, dp), lambda qi, ki: (ki, 0)),
            pl.BlockSpec((1, tk), lambda qi, ki: (0, ki)),
        ],
        out_specs=pl.BlockSpec((tq, dp), lambda qi, ki: (qi, 0)),
        scratch_shapes=[pltpu.VMEM((tq, 1), jnp.float32),
                        pltpu.VMEM((tq, 1), jnp.float32),
                        pltpu.VMEM((tq, dp), jnp.float32)],
        compiler_params=_cp(("parallel", "arbitrary")),
    )(Q, K, V, key_bias)


def decoder_tail(H3v, w_lin, b_lin, dec2, dec3, tm):
    _, Np, dp_out = H3v.shape
    dp_h2 = dec2[-1][0].shape[1]
    dp_h3 = dec3[-1][0].shape[1]

    in_specs = [
        pl.BlockSpec((3, tm, dp_out), lambda i: (0, i, 0)),
        pl.BlockSpec(w_lin.shape, lambda i: (0, 0, 0)),
        pl.BlockSpec(b_lin.shape, lambda i: (0, 0)),
    ]
    args = [H3v, w_lin, b_lin]
    for (w, b) in list(dec2) + list(dec3):
        in_specs.append(pl.BlockSpec(w.shape, lambda i: (0, 0)))
        in_specs.append(pl.BlockSpec(b.shape, lambda i: (0, 0)))
        args += [w, b]

    kernel = functools.partial(_tail_kernel, dec_layer=len(dec2))
    return pl.pallas_call(
        kernel,
        out_shape=(jax.ShapeDtypeStruct((Np, 3 * dp_out), H3v.dtype),
                   jax.ShapeDtypeStruct((Np, dp_h2), H3v.dtype),
                   jax.ShapeDtypeStruct((Np, dp_h3), H3v.dtype)),
        grid=(Np // tm,),
        in_specs=in_specs,
        out_specs=(pl.BlockSpec((tm, 3 * dp_out), lambda i: (i, 0)),
                   pl.BlockSpec((tm, dp_h2), lambda i: (i, 0)),
                   pl.BlockSpec((tm, dp_h3), lambda i: (i, 0))),
        compiler_params=_cp(("parallel",)),
    )(*args)


# ----------------------------------------------------------------------------
# Parameter initialization (deterministic, PyTorch-Linear-style uniform fan-in)
# Weights are stored lane-padded (multiple of 128) with zero padding; raw
# (unpadded) copies are kept for the pure-JAX reference check.
# ----------------------------------------------------------------------------
def init_linear(key, d_in, d_out):
    kw, kb = jax.random.split(key)
    bound = 1.0 / sqrt(d_in)
    w = jax.random.uniform(kw, (d_in, d_out), jnp.float32, -bound, bound)
    b = jax.random.uniform(kb, (d_out,), jnp.float32, -bound, bound)
    return w, b


def _pad_w(w, pr, pc):
    return jnp.pad(w, ((0, pr - w.shape[0]), (0, pc - w.shape[1])))


def _pad_b(b, pc):
    return jnp.pad(b, ((0, pc - b.shape[0]),)).reshape(1, pc)


def init_mgcat(key, h1_dim, h2_dim, h3_dim, input_dim, hidden_dim, out_dim,
               enc_layer, dec_layer):
    ph1, ph2, ph3 = _rup(h1_dim, LANE), _rup(h2_dim, LANE), _rup(h3_dim, LANE)
    pin, pout = _rup(input_dim, LANE), _rup(out_dim, LANE)

    keys = jax.random.split(key, 8)
    params, raw = {}, {}

    # transforms
    for name, k, din, pdin in (("t1", keys[0], h1_dim, ph1),
                               ("t2", keys[1], h2_dim, ph2),
                               ("t3", keys[2], h3_dim, ph3)):
        w, b = init_linear(k, din, input_dim)
        raw[name] = (w, b)
        params[name + "_w"] = _pad_w(w, pdin, pin)
        params[name + "_b"] = _pad_b(b, pin)

    # encoder (CrossAttention layers) — packed [Wq|Wk|Wv]
    # (for enc_layer == 1 the last layer maps to out_dim so the tail shapes
    #  stay consistent)
    enc_dims = []
    for i in range(enc_layer):
        if i == 0:
            d_in = input_dim
            d_out = hidden_dim if enc_layer > 1 else out_dim
        elif i == enc_layer - 1:
            d_in, d_out = hidden_dim, out_dim
        else:
            d_in, d_out = hidden_dim, hidden_dim
        enc_dims.append((d_in, d_out))

    enc_params, enc_raw = [], []
    enc_keys = jax.random.split(keys[3], max(enc_layer, 1))
    for i, (d_in, d_out) in enumerate(enc_dims):
        kq, kk, kv = jax.random.split(enc_keys[i], 3)
        pd_in, pd_out = _rup(d_in, LANE), _rup(d_out, LANE)
        wq, bq = init_linear(kq, d_in, d_out)
        wk, bk = init_linear(kk, d_in, d_out)
        wv, bv = init_linear(kv, d_in, d_out)
        enc_raw.append((wq, bq, wk, bk, wv, bv))
        w_qkv = jnp.concatenate([_pad_w(wq, pd_in, pd_out),
                                 _pad_w(wk, pd_in, pd_out),
                                 _pad_w(wv, pd_in, pd_out)], axis=1)
        b_qkv = jnp.concatenate([_pad_b(bq, pd_out),
                                 _pad_b(bk, pd_out),
                                 _pad_b(bv, pd_out)], axis=1)
        enc_params.append({"w_qkv": w_qkv, "b_qkv": b_qkv})
    params["encoder"] = enc_params
    raw["enc"] = enc_raw

    # lin: Linear(3*out_dim, out_dim) + ReLU, stored as (3, pout, pout) blocks
    w_lin, b_lin = init_linear(keys[4], 3 * out_dim, out_dim)
    raw["lin"] = (w_lin, b_lin)
    w_lin3 = jnp.zeros((3, pout, pout), jnp.float32)
    for v in range(3):
        w_lin3 = w_lin3.at[v, :out_dim, :out_dim].set(
            w_lin[v * out_dim:(v + 1) * out_dim, :])
    params["lin_w"] = w_lin3
    params["lin_b"] = _pad_b(b_lin, pout)

    # two decoders (out_dim -> hidden_dim -> h{2,3}_dim), ReLU after each layer
    def dec_dims(target):
        dims = []
        for i in range(dec_layer):
            if dec_layer > 1:
                if i == 0:
                    dims.append((out_dim, hidden_dim))
                elif i == dec_layer - 1:
                    dims.append((hidden_dim, target))
                else:
                    dims.append((hidden_dim, hidden_dim))
            else:
                dims.append((out_dim, target))
        return dims

    def make_decoder(k, dims):
        padded, rawl = [], []
        dk = jax.random.split(k, max(len(dims), 1))
        for i, (di, do) in enumerate(dims):
            w, b = init_linear(dk[i], di, do)
            rawl.append((w, b))
            padded.append((_pad_w(w, _rup(di, LANE), _rup(do, LANE)),
                           _pad_b(b, _rup(do, LANE))))
        return padded, rawl

    params["dec2"], raw["dec2"] = make_decoder(keys[5], dec_dims(h2_dim))
    params["dec3"], raw["dec3"] = make_decoder(keys[6], dec_dims(h3_dim))

    cfg = dict(h1_dim=h1_dim, h2_dim=h2_dim, h3_dim=h3_dim,
               input_dim=input_dim, hidden_dim=hidden_dim, out_dim=out_dim,
               enc_layer=enc_layer, dec_layer=dec_layer, enc_dims=enc_dims)
    return cfg, params, raw


# ----------------------------------------------------------------------------
# Forward pass
# ----------------------------------------------------------------------------
def _pad_rows(H, Np, pcols):
    return jnp.pad(H, ((0, Np - H.shape[0]), (0, pcols - H.shape[1])))


def _make_key_bias(N, Np):
    row = jnp.arange(Np, dtype=jnp.int32)
    b = jnp.where(row < N, 0.0, NEG_BIG).astype(jnp.float32)
    return jnp.tile(b, 3).reshape(1, 3 * Np)


def _forward_fused(cfg, params, H1, H2, H3, N):
    Np = _rup(N, 8)
    H1p = _pad_rows(H1, Np, params["t1_w"].shape[0])
    H2p = _pad_rows(H2, Np, params["t2_w"].shape[0])
    H3p = _pad_rows(H3, Np, params["t3_w"].shape[0])
    key_bias = _make_key_bias(N, Np)
    return fused_forward(cfg, params, H1p, H2p, H3p, key_bias, Np)


def _forward_multi(cfg, params, H1, H2, H3, N):
    if N <= SMALL_ROWS:
        Np = _rup(N, 8)
        tm_g, tm_qkv, tq_a, tk_a = Np, 3 * Np, 3 * Np, 3 * Np
    else:
        Np = _rup(N, TM_GEMM)
        tm_g, tm_qkv, tq_a, tk_a = TM_GEMM, TM_QKV, TQ_ATTN, TK_ATTN

    H1p = _pad_rows(H1, Np, params["t1_w"].shape[0])
    H2p = _pad_rows(H2, Np, params["t2_w"].shape[0])
    H3p = _pad_rows(H3, Np, params["t3_w"].shape[0])
    key_bias = _make_key_bias(N, Np)

    # fused transform1/2/3 -> (3, Np, pin), then stack views row-major
    H_all = fused_transform(H1p, H2p, H3p,
                            params["t1_w"], params["t1_b"],
                            params["t2_w"], params["t2_b"],
                            params["t3_w"], params["t3_b"], tm_g)
    Hs = H_all.reshape(3 * Np, H_all.shape[-1])

    # encoder: per layer one packed QKV GEMM + one flash-attention kernel
    for layer_p, (_d_in, d_out) in zip(params["encoder"], cfg["enc_dims"]):
        Q, K, V = qkv_project(Hs, layer_p["w_qkv"], layer_p["b_qkv"], tm_qkv)
        Hs = cross_attention(Q, K, V, key_bias, scale=1.0 / sqrt(d_out),
                             tq=tq_a, tk=tk_a)

    H3v = Hs.reshape(3, Np, Hs.shape[-1])
    return decoder_tail(H3v, params["lin_w"], params["lin_b"],
                        params["dec2"], params["dec3"], tm_g)


def mgcat_forward(cfg, params, H1, H2, H3, edge_index, force_multi=False):
    del edge_index  # TODO(synk): edge_index masking not specified in reference.
    N = H1.shape[0]

    use_fused = (not force_multi) and (
        _fused_vmem_estimate(cfg, params, _rup(N, 8)) <= FUSED_VMEM_BUDGET)
    if use_fused:
        hcatp, out2p, out3p = _forward_fused(cfg, params, H1, H2, H3, N)
    else:
        hcatp, out2p, out3p = _forward_multi(cfg, params, H1, H2, H3, N)

    pout = params["lin_w"].shape[1]
    out_dim = cfg["out_dim"]
    H_cat = jnp.concatenate(
        [hcatp[:N, v * pout:v * pout + out_dim] for v in range(3)], axis=1)
    out2 = out2p[:N, :cfg["h2_dim"]]
    out3 = out3p[:N, :cfg["h3_dim"]]
    return H_cat, out2, out3


# ----------------------------------------------------------------------------
# Pure-JAX reference (unpadded) for correctness checking
# ----------------------------------------------------------------------------
def mgcat_reference(cfg, raw, H1, H2, H3):
    relu = jax.nn.relu
    h1 = H1 @ raw["t1"][0] + raw["t1"][1]
    h2 = H2 @ raw["t2"][0] + raw["t2"][1]
    h3 = H3 @ raw["t3"][0] + raw["t3"][1]
    H = jnp.concatenate([h1, h2, h3], axis=0)
    for (wq, bq, wk, bk, wv, bv), (_di, d_out) in zip(raw["enc"],
                                                      cfg["enc_dims"]):
        q = H @ wq + bq
        k = H @ wk + bk
        v = H @ wv + bv
        s = (q @ k.T) / sqrt(d_out)
        p = jax.nn.softmax(s, axis=-1)
        H = p @ v
    N = H1.shape[0]
    a, b, c = H[:N], H[N:2 * N], H[2 * N:]
    hcat = jnp.concatenate([a, b, c], axis=1)
    h = relu(hcat @ raw["lin"][0] + raw["lin"][1])
    o2 = h
    for (w, bb) in raw["dec2"]:
        o2 = relu(o2 @ w + bb)
    o3 = h
    for (w, bb) in raw["dec3"]:
        o3 = relu(o3 @ w + bb)
    return hcat, o2, o3


# ----------------------------------------------------------------------------
# Main
# ----------------------------------------------------------------------------
if __name__ == "__main__":
    # small shapes: N=8 nodes
    N = 8
    h1_dim, h2_dim, h3_dim = 12, 10, 6
    input_dim, hidden_dim, out_dim = 16, 32, 16
    enc_layer, dec_layer = 2, 2

    key = jax.random.PRNGKey(0)
    kp, k1, k2, k3, ke = jax.random.split(key, 5)

    cfg, params, raw = init_mgcat(kp, h1_dim, h2_dim, h3_dim, input_dim,
                                  hidden_dim, out_dim, enc_layer, dec_layer)

    H1 = jax.random.normal(k1, (N, h1_dim), jnp.float32)   # data['adj']
    H2 = jax.random.normal(k2, (N, h2_dim), jnp.float32)   # data['refex']
    H3 = jax.random.normal(k3, (N, h3_dim), jnp.float32)   # data['motif']
    edge_index = jax.random.randint(ke, (2, 16), 0, N)      # data.edge_index

    fwd_fused = jax.jit(functools.partial(mgcat_forward, cfg))
    fwd_multi = jax.jit(functools.partial(mgcat_forward, cfg, force_multi=True))

    hc_f, o2_f, o3_f = fwd_fused(params, H1, H2, H3, edge_index)
    jax.block_until_ready((hc_f, o2_f, o3_f))
    hc_m, o2_m, o3_m = fwd_multi(params, H1, H2, H3, edge_index)
    jax.block_until_ready((hc_m, o2_m, o3_m))
    hc_r, o2_r, o3_r = mgcat_reference(cfg, raw, H1, H2, H3)

    assert hc_f.shape == (N, 3 * out_dim)
    assert o2_f.shape == (N, h2_dim)
    assert o3_f.shape == (N, h3_dim)
    for t in (hc_f, o2_f, o3_f, hc_m, o2_m, o3_m):
        assert bool(jnp.all(jnp.isfinite(t)))

    def max_err(a, b):
        return float(jnp.max(jnp.abs(a - b)))

    # fused-vs-reference and multi-vs-reference (loose tol for MXU precision)
    assert max_err(hc_f, hc_r) < 1e-1
    assert max_err(o2_f, o2_r) < 1e-1
    assert max_err(o3_f, o3_r) < 1e-1
    assert max_err(hc_m, hc_r) < 1e-1
    assert max_err(o2_m, o2_r) < 1e-1
    assert max_err(o3_m, o3_r) < 1e-1
    # both Pallas paths agree tightly with each other
    assert max_err(hc_f, hc_m) < 5e-2
    assert max_err(o2_f, o2_m) < 5e-2
    assert max_err(o3_f, o3_m) < 5e-2

    print("KERNEL_OK")
</pallas_src>

<mosaic_0001>
module attributes {stable_mosaic.version = 11 : i64} {
  func.func @_fused_forward_kernel(%arg0: memref<8x128xf32, #tpu.memory_space<vmem>>, %arg1: memref<8x128xf32, #tpu.memory_space<vmem>>, %arg2: memref<8x128xf32, #tpu.memory_space<vmem>>, %arg3: memref<128x128xf32, #tpu.memory_space<vmem>>, %arg4: memref<1x128xf32, #tpu.memory_space<vmem>>, %arg5: memref<128x128xf32, #tpu.memory_space<vmem>>, %arg6: memref<1x128xf32, #tpu.memory_space<vmem>>, %arg7: memref<128x128xf32, #tpu.memory_space<vmem>>, %arg8: memref<1x128xf32, #tpu.memory_space<vmem>>, %arg9: memref<1x24xf32, #tpu.memory_space<vmem>>, %arg10: memref<128x384xf32, #tpu.memory_space<vmem>>, %arg11: memref<1x384xf32, #tpu.memory_space<vmem>>, %arg12: memref<128x384xf32, #tpu.memory_space<vmem>>, %arg13: memref<1x384xf32, #tpu.memory_space<vmem>>, %arg14: memref<3x128x128xf32, #tpu.memory_space<vmem>>, %arg15: memref<1x128xf32, #tpu.memory_space<vmem>>, %arg16: memref<128x128xf32, #tpu.memory_space<vmem>>, %arg17: memref<1x128xf32, #tpu.memory_space<vmem>>, %arg18: memref<128x128xf32, #tpu.memory_space<vmem>>, %arg19: memref<1x128xf32, #tpu.memory_space<vmem>>, %arg20: memref<128x128xf32, #tpu.memory_space<vmem>>, %arg21: memref<1x128xf32, #tpu.memory_space<vmem>>, %arg22: memref<128x128xf32, #tpu.memory_space<vmem>>, %arg23: memref<1x128xf32, #tpu.memory_space<vmem>>, %arg24: memref<8x384xf32, #tpu.memory_space<vmem>>, %arg25: memref<8x128xf32, #tpu.memory_space<vmem>>, %arg26: memref<8x128xf32, #tpu.memory_space<vmem>>) attributes {dimension_semantics = [], scalar_prefetch = 0 : i64, scratch_operands = 0 : i64, tpu.core_type = #tpu.core_type<tc>} {
    %c0 = arith.constant 0 : index
    %c0_0 = arith.constant 0 : index
    %0 = vector.load %arg0[%c0, %c0_0] : memref<8x128xf32, #tpu.memory_space<vmem>>, vector<8x128xf32>
    %c0_1 = arith.constant 0 : index
    %c0_2 = arith.constant 0 : index
    %1 = vector.load %arg3[%c0_1, %c0_2] : memref<128x128xf32, #tpu.memory_space<vmem>>, vector<128x128xf32>
    %cst = arith.constant dense<0.000000e+00> : vector<8x128xf32>
    %2 = tpu.matmul %0, %1, %cst {dimension_numbers = #tpu.dot_dimension_numbers<[1], [0], [0], [1], [0, 0, 1, 1], [], []>} : vector<8x128xf32>, vector<128x128xf32>, vector<8x128xf32> -> vector<8x128xf32>
    %c0_3 = arith.constant 0 : index
    %c0_4 = arith.constant 0 : index
    %3 = vector.load %arg4[%c0_3, %c0_4] : memref<1x128xf32, #tpu.memory_space<vmem>>, vector<1x128xf32>
    %4 = vector.broadcast %3 : vector<1x128xf32> to vector<8x128xf32>
    %5 = arith.addf %2, %4 : vector<8x128xf32>
    %c0_5 = arith.constant 0 : index
    %c0_6 = arith.constant 0 : index
    %6 = vector.load %arg1[%c0_5, %c0_6] : memref<8x128xf32, #tpu.memory_space<vmem>>, vector<8x128xf32>
    %c0_7 = arith.constant 0 : index
    %c0_8 = arith.constant 0 : index
    %7 = vector.load %arg5[%c0_7, %c0_8] : memref<128x128xf32, #tpu.memory_space<vmem>>, vector<128x128xf32>
    %cst_9 = arith.constant dense<0.000000e+00> : vector<8x128xf32>
    %8 = tpu.matmul %6, %7, %cst_9 {dimension_numbers = #tpu.dot_dimension_numbers<[1], [0], [0], [1], [0, 0, 1, 1], [], []>} : vector<8x128xf32>, vector<128x128xf32>, vector<8x128xf32> -> vector<8x128xf32>
    %c0_10 = arith.constant 0 : index
    %c0_11 = arith.constant 0 : index
    %9 = vector.load %arg6[%c0_10, %c0_11] : memref<1x128xf32, #tpu.memory_space<vmem>>, vector<1x128xf32>
    %10 = vector.broadcast %9 : vector<1x128xf32> to vector<8x128xf32>
    %11 = arith.addf %8, %10 : vector<8x128xf32>
    %c0_12 = arith.constant 0 : index
    %c0_13 = arith.constant 0 : index
    %12 = vector.load %arg2[%c0_12, %c0_13] : memref<8x128xf32, #tpu.memory_space<vmem>>, vector<8x128xf32>
    %c0_14 = arith.constant 0 : index
    %c0_15 = arith.constant 0 : index
    %13 = vector.load %arg7[%c0_14, %c0_15] : memref<128x128xf32, #tpu.memory_space<vmem>>, vector<128x128xf32>
    %cst_16 = arith.constant dense<0.000000e+00> : vector<8x128xf32>
    %14 = tpu.matmul %12, %13, %cst_16 {dimension_numbers = #tpu.dot_dimension_numbers<[1], [0], [0], [1], [0, 0, 1, 1], [], []>} : vector<8x128xf32>, vector<128x128xf32>, vector<8x128xf32> -> vector<8x128xf32>
    %c0_17 = arith.constant 0 : index
    %c0_18 = arith.constant 0 : index
    %15 = vector.load %arg8[%c0_17, %c0_18] : memref<1x128xf32, #tpu.memory_space<vmem>>, vector<1x128xf32>
    %16 = vector.broadcast %15 : vector<1x128xf32> to vector<8x128xf32>
    %17 = arith.addf %14, %16 : vector<8x128xf32>
    %18 = tpu.concatenate %5, %11, %17 in 0 : vector<8x128xf32>, vector<8x128xf32>, vector<8x128xf32> -> vector<24x128xf32>
    %c0_19 = arith.constant 0 : index
    %c0_20 = arith.constant 0 : index
    %19 = vector.load %arg9[%c0_19, %c0_20] : memref<1x24xf32, #tpu.memory_space<vmem>>, vector<1x24xf32>
    %c0_21 = arith.constant 0 : index
    %c0_22 = arith.constant 0 : index
    %20 = vector.load %arg10[%c0_21, %c0_22] : memref<128x384xf32, #tpu.memory_space<vmem>>, vector<128x384xf32>
    %cst_23 = arith.constant dense<0.000000e+00> : vector<24x384xf32>
    %21 = tpu.matmul %18, %20, %cst_23 {dimension_numbers = #tpu.dot_dimension_numbers<[1], [0], [0], [1], [0, 0, 1, 1], [], []>} : vector<24x128xf32>, vector<128x384xf32>, vector<24x384xf32> -> vector<24x384xf32>
    %c0_24 = arith.constant 0 : index
    %c0_25 = arith.constant 0 : index
    %22 = vector.load %arg11[%c0_24, %c0_25] : memref<1x384xf32, #tpu.memory_space<vmem>>, vector<1x384xf32>
    %23 = vector.broadcast %22 : vector<1x384xf32> to vector<24x384xf32>
    %24 = arith.addf %21, %23 : vector<24x384xf32>
    %25 = vector.extract_strided_slice %24 {offsets = [0, 0], sizes = [24, 128], strides = [1, 1]} : vector<24x384xf32> to vector<24x128xf32>
    %26 = vector.extract_strided_slice %24 {offsets = [0, 128], sizes = [24, 128], strides = [1, 1]} : vector<24x384xf32> to vector<24x128xf32>
    %27 = vector.extract_strided_slice %24 {offsets = [0, 256], sizes = [24, 128], strides = [1, 1]} : vector<24x384xf32> to vector<24x128xf32>
    %cst_26 = arith.constant dense<0.000000e+00> : vector<24x24xf32>
    %28 = tpu.matmul %25, %26, %cst_26 {dimension_numbers = #tpu.dot_dimension_numbers<[1], [1], [0], [0], [0, 0, 1, 0], [], []>} : vector<24x128xf32>, vector<24x128xf32>, vector<24x24xf32> -> vector<24x24xf32>
    %cst_27 = arith.constant 0.176776692 : f32
    %29 = vector.broadcast %cst_27 : f32 to vector<24x24xf32>
    %30 = arith.mulf %28, %29 : vector<24x24xf32>
    %31 = vector.broadcast %19 : vector<1x24xf32> to vector<24x24xf32>
    %32 = arith.addf %30, %31 : vector<24x24xf32>
    %cst_28 = arith.constant dense<0xFF800000> : vector<24xf32>
    %33 = vector.multi_reduction <maximumf>, %32, %cst_28 [1] : vector<24x24xf32> to vector<24xf32>
    %34 = vector.shape_cast %33 : vector<24xf32> to vector<24x1xf32>
    %35 = vector.broadcast %34 : vector<24x1xf32> to vector<24x24xf32>
    %36 = arith.subf %32, %35 : vector<24x24xf32>
    %37 = math.exp %36 : vector<24x24xf32>
    %cst_29 = arith.constant dense<0.000000e+00> : vector<24xf32>
    %38 = vector.multi_reduction <add>, %37, %cst_29 [1] : vector<24x24xf32> to vector<24xf32>
    %39 = vector.shape_cast %38 : vector<24xf32> to vector<24x1xf32>
    %cst_30 = arith.constant dense<0.000000e+00> : vector<24x128xf32>
    %40 = tpu.matmul %37, %27, %cst_30 {dimension_numbers = #tpu.dot_dimension_numbers<[1], [0], [0], [1], [0, 0, 1, 1], [], []>} : vector<24x24xf32>, vector<24x128xf32>, vector<24x128xf32> -> vector<24x128xf32>
    %41 = vector.broadcast %39 : vector<24x1xf32> to vector<24x128xf32>
    %42 = arith.divf %40, %41 : vector<24x128xf32>
    %c0_31 = arith.constant 0 : index
    %c0_32 = arith.constant 0 : index
    %43 = vector.load %arg12[%c0_31, %c0_32] : memref<128x384xf32, #tpu.memory_space<vmem>>, vector<128x384xf32>
    %cst_33 = arith.constant dense<0.000000e+00> : vector<24x384xf32>
    %44 = tpu.matmul %42, %43, %cst_33 {dimension_numbers = #tpu.dot_dimension_numbers<[1], [0], [0], [1], [0, 0, 1, 1], [], []>} : vector<24x128xf32>, vector<128x384xf32>, vector<24x384xf32> -> vector<24x384xf32>
    %c0_34 = arith.constant 0 : index
    %c0_35 = arith.constant 0 : index
    %45 = vector.load %arg13[%c0_34, %c0_35] : memref<1x384xf32, #tpu.memory_space<vmem>>, vector<1x384xf32>
    %46 = vector.broadcast %45 : vector<1x384xf32> to vector<24x384xf32>
    %47 = arith.addf %44, %46 : vector<24x384xf32>
    %48 = vector.extract_strided_slice %47 {offsets = [0, 0], sizes = [24, 128], strides = [1, 1]} : vector<24x384xf32> to vector<24x128xf32>
    %49 = vector.extract_strided_slice %47 {offsets = [0, 128], sizes = [24, 128], strides = [1, 1]} : vector<24x384xf32> to vector<24x128xf32>
    %50 = vector.extract_strided_slice %47 {offsets = [0, 256], sizes = [24, 128], strides = [1, 1]} : vector<24x384xf32> to vector<24x128xf32>
    %cst_36 = arith.constant dense<0.000000e+00> : vector<24x24xf32>
    %51 = tpu.matmul %48, %49, %cst_36 {dimension_numbers = #tpu.dot_dimension_numbers<[1], [1], [0], [0], [0, 0, 1, 0], [], []>} : vector<24x128xf32>, vector<24x128xf32>, vector<24x24xf32> -> vector<24x24xf32>
    %cst_37 = arith.constant 2.500000e-01 : f32
    %52 = vector.broadcast %cst_37 : f32 to vector<24x24xf32>
    %53 = arith.mulf %51, %52 : vector<24x24xf32>
    %54 = vector.broadcast %19 : vector<1x24xf32> to vector<24x24xf32>
    %55 = arith.addf %53, %54 : vector<24x24xf32>
    %cst_38 = arith.constant dense<0xFF800000> : vector<24xf32>
    %56 = vector.multi_reduction <maximumf>, %55, %cst_38 [1] : vector<24x24xf32> to vector<24xf32>
    %57 = vector.shape_cast %56 : vector<24xf32> to vector<24x1xf32>
    %58 = vector.broadcast %57 : vector<24x1xf32> to vector<24x24xf32>
    %59 = arith.subf %55, %58 : vector<24x24xf32>
    %60 = math.exp %59 : vector<24x24xf32>
    %cst_39 = arith.constant dense<0.000000e+00> : vector<24xf32>
    %61 = vector.multi_reduction <add>, %60, %cst_39 [1] : vector<24x24xf32> to vector<24xf32>
    %62 = vector.shape_cast %61 : vector<24xf32> to vector<24x1xf32>
    %cst_40 = arith.constant dense<0.000000e+00> : vector<24x128xf32>
    %63 = tpu.matmul %60, %50, %cst_40 {dimension_numbers = #tpu.dot_dimension_numbers<[1], [0], [0], [1], [0, 0, 1, 1], [], []>} : vector<24x24xf32>, vector<24x128xf32>, vector<24x128xf32> -> vector<24x128xf32>
    %64 = vector.broadcast %62 : vector<24x1xf32> to vector<24x128xf32>
    %65 = arith.divf %63, %64 : vector<24x128xf32>
    %66 = vector.extract_strided_slice %65 {offsets = [0, 0], sizes = [8, 128], strides = [1, 1]} : vector<24x128xf32> to vector<8x128xf32>
    %67 = vector.extract_strided_slice %65 {offsets = [8, 0], sizes = [8, 128], strides = [1, 1]} : vector<24x128xf32> to vector<8x128xf32>
    %68 = vector.extract_strided_slice %65 {offsets = [16, 0], sizes = [8, 128], strides = [1, 1]} : vector<24x128xf32> to vector<8x128xf32>
    %c0_41 = arith.constant 0 : index
    %c0_42 = arith.constant 0 : index
    %69 = vector.load %arg24[%c0_41, %c0_42] : memref<8x384xf32, #tpu.memory_space<vmem>>, vector<8x128xf32>
    tpu.vector_store %arg24[%c0_41, %c0_42], %66 {strides = array<i32>} : memref<8x384xf32, #tpu.memory_space<vmem>>, vector<8x128xf32>,
    %c0_43 = arith.constant 0 : index
    %c128 = arith.constant 128 : index
    %70 = vector.load %arg24[%c0_43, %c128] : memref<8x384xf32, #tpu.memory_space<vmem>>, vector<8x128xf32>
    tpu.vector_store %arg24[%c0_43, %c128], %67 {strides = array<i32>} : memref<8x384xf32, #tpu.memory_space<vmem>>, vector<8x128xf32>,
    %c0_44 = arith.constant 0 : index
    %c256 = arith.constant 256 : index
    %71 = vector.load %arg24[%c0_44, %c256] : memref<8x384xf32, #tpu.memory_space<vmem>>, vector<8x128xf32>
    tpu.vector_store %arg24[%c0_44, %c256], %68 {strides = array<i32>} : memref<8x384xf32, #tpu.memory_space<vmem>>, vector<8x128xf32>,
    %c0_45 = arith.constant 0 : index
    %c0_46 = arith.constant 0 : index
    %c0_47 = arith.constant 0 : index
    %72 = vector.load %arg14[%c0_45, %c0_46, %c0_47] : memref<3x128x128xf32, #tpu.memory_space<vmem>>, vector<1x128x128xf32>
    %73 = vector.shape_cast %72 : vector<1x128x128xf32> to vector<128x128xf32>
    %cst_48 = arith.constant dense<0.000000e+00> : vector<8x128xf32>
    %74 = tpu.matmul %66, %73, %cst_48 {dimension_numbers = #tpu.dot_dimension_numbers<[1], [0], [0], [1], [0, 0, 1, 1], [], []>} : vector<8x128xf32>, vector<128x128xf32>, vector<8x128xf32> -> vector<8x128xf32>
    %c1 = arith.constant 1 : index
    %c0_49 = arith.constant 0 : index
    %c0_50 = arith.constant 0 : index
    %75 = vector.load %arg14[%c1, %c0_49, %c0_50] : memref<3x128x128xf32, #tpu.memory_space<vmem>>, vector<1x128x128xf32>
    %76 = vector.shape_cast %75 : vector<1x128x128xf32> to vector<128x128xf32>
    %cst_51 = arith.constant dense<0.000000e+00> : vector<8x128xf32>
    %77 = tpu.matmul %67, %76, %cst_51 {dimension_numbers = #tpu.dot_dimension_numbers<[1], [0], [0], [1], [0, 0, 1, 1], [], []>} : vector<8x128xf32>, vector<128x128xf32>, vector<8x128xf32> -> vector<8x128xf32>
    %78 = arith.addf %74, %77 : vector<8x128xf32>
    %c2 = arith.constant 2 : index
    %c0_52 = arith.constant 0 : index
    %c0_53 = arith.constant 0 : index
    %79 = vector.load %arg14[%c2, %c0_52, %c0_53] : memref<3x128x128xf32, #tpu.memory_space<vmem>>, vector<1x128x128xf32>
    %80 = vector.shape_cast %79 : vector<1x128x128xf32> to vector<128x128xf32>
    %cst_54 = arith.constant dense<0.000000e+00> : vector<8x128xf32>
    %81 = tpu.matmul %68, %80, %cst_54 {dimension_numbers = #tpu.dot_dimension_numbers<[1], [0], [0], [1], [0, 0, 1, 1], [], []>} : vector<8x128xf32>, vector<128x128xf32>, vector<8x128xf32> -> vector<8x128xf32>
    %82 = arith.addf %78, %81 : vector<8x128xf32>
    %c0_55 = arith.constant 0 : index
    %c0_56 = arith.constant 0 : index
    %83 = vector.load %arg15[%c0_55, %c0_56] : memref<1x128xf32, #tpu.memory_space<vmem>>, vector<1x128xf32>
    %84 = vector.broadcast %83 : vector<1x128xf32> to vector<8x128xf32>
    %85 = arith.addf %82, %84 : vector<8x128xf32>
    %cst_57 = arith.constant 0.000000e+00 : f32
    %86 = vector.broadcast %cst_57 : f32 to vector<8x128xf32>
    %87 = arith.maximumf %85, %86 : vector<8x128xf32>
    %c0_58 = arith.constant 0 : index
    %c0_59 = arith.constant 0 : index
    %88 = vector.load %arg16[%c0_58, %c0_59] : memref<128x128xf32, #tpu.memory_space<vmem>>, vector<128x128xf32>
    %cst_60 = arith.constant dense<0.000000e+00> : vector<8x128xf32>
    %89 = tpu.matmul %87, %88, %cst_60 {dimension_numbers = #tpu.dot_dimension_numbers<[1], [0], [0], [1], [0, 0, 1, 1], [], []>} : vector<8x128xf32>, vector<128x128xf32>, vector<8x128xf32> -> vector<8x128xf32>
    %c0_61 = arith.constant 0 : index
    %c0_62 = arith.constant 0 : index
    %90 = vector.load %arg17[%c0_61, %c0_62] : memref<1x128xf32, #tpu.memory_space<vmem>>, vector<1x128xf32>
    %91 = vector.broadcast %90 : vector<1x128xf32> to vector<8x128xf32>
    %92 = arith.addf %89, %91 : vector<8x128xf32>
    %cst_63 = arith.constant 0.000000e+00 : f32
    %93 = vector.broadcast %cst_63 : f32 to vector<8x128xf32>
    %94 = arith.maximumf %92, %93 : vector<8x128xf32>
    %c0_64 = arith.constant 0 : index
    %c0_65 = arith.constant 0 : index
    %95 = vector.load %arg18[%c0_64, %c0_65] : memref<128x128xf32, #tpu.memory_space<vmem>>, vector<128x128xf32>
    %cst_66 = arith.constant dense<0.000000e+00> : vector<8x128xf32>
    %96 = tpu.matmul %94, %95, %cst_66 {dimension_numbers = #tpu.dot_dimension_numbers<[1], [0], [0], [1], [0, 0, 1, 1], [], []>} : vector<8x128xf32>, vector<128x128xf32>, vector<8x128xf32> -> vector<8x128xf32>
    %c0_67 = arith.constant 0 : index
    %c0_68 = arith.constant 0 : index
    %97 = vector.load %arg19[%c0_67, %c0_68] : memref<1x128xf32, #tpu.memory_space<vmem>>, vector<1x128xf32>
    %98 = vector.broadcast %97 : vector<1x128xf32> to vector<8x128xf32>
    %99 = arith.addf %96, %98 : vector<8x128xf32>
    %cst_69 = arith.constant 0.000000e+00 : f32
    %100 = vector.broadcast %cst_69 : f32 to vector<8x128xf32>
    %101 = arith.maximumf %99, %100 : vector<8x128xf32>
    %c0_70 = arith.constant 0 : index
    %c0_71 = arith.constant 0 : index
    %102 = vector.load %arg25[%c0_70, %c0_71] : memref<8x128xf32, #tpu.memory_space<vmem>>, vector<8x128xf32>
    tpu.vector_store %arg25[%c0_70, %c0_71], %101 {strides = array<i32>} : memref<8x128xf32, #tpu.memory_space<vmem>>, vector<8x128xf32>,
    %c0_72 = arith.constant 0 : index
    %c0_73 = arith.constant 0 : index
    %103 = vector.load %arg20[%c0_72, %c0_73] : memref<128x128xf32, #tpu.memory_space<vmem>>, vector<128x128xf32>
    %cst_74 = arith.constant dense<0.000000e+00> : vector<8x128xf32>
    %104 = tpu.matmul %87, %103, %cst_74 {dimension_numbers = #tpu.dot_dimension_numbers<[1], [0], [0], [1], [0, 0, 1, 1], [], []>} : vector<8x128xf32>, vector<128x128xf32>, vector<8x128xf32> -> vector<8x128xf32>
    %c0_75 = arith.constant 0 : index
    %c0_76 = arith.constant 0 : index
    %105 = vector.load %arg21[%c0_75, %c0_76] : memref<1x128xf32, #tpu.memory_space<vmem>>, vector<1x128xf32>
    %106 = vector.broadcast %105 : vector<1x128xf32> to vector<8x128xf32>
    %107 = arith.addf %104, %106 : vector<8x128xf32>
    %cst_77 = arith.constant 0.000000e+00 : f32
    %108 = vector.broadcast %cst_77 : f32 to vector<8x128xf32>
    %109 = arith.maximumf %107, %108 : vector<8x128xf32>
    %c0_78 = arith.constant 0 : index
    %c0_79 = arith.constant 0 : index
    %110 = vector.load %arg22[%c0_78, %c0_79] : memref<128x128xf32, #tpu.memory_space<vmem>>, vector<128x128xf32>
    %cst_80 = arith.constant dense<0.000000e+00> : vector<8x128xf32>
    %111 = tpu.matmul %109, %110, %cst_80 {dimension_numbers = #tpu.dot_dimension_numbers<[1], [0], [0], [1], [0, 0, 1, 1], [], []>} : vector<8x128xf32>, vector<128x128xf32>, vector<8x128xf32> -> vector<8x128xf32>
    %c0_81 = arith.constant 0 : index
    %c0_82 = arith.constant 0 : index
    %112 = vector.load %arg23[%c0_81, %c0_82] : memref<1x128xf32, #tpu.memory_space<vmem>>, vector<1x128xf32>
    %113 = vector.broadcast %112 : vector<1x128xf32> to vector<8x128xf32>
    %114 = arith.addf %111, %113 : vector<8x128xf32>
    %cst_83 = arith.constant 0.000000e+00 : f32
    %115 = vector.broadcast %cst_83 : f32 to vector<8x128xf32>
    %116 = arith.maximumf %114, %115 : vector<8x128xf32>
    %c0_84 = arith.constant 0 : index
    %c0_85 = arith.constant 0 : index
    %117 = vector.load %arg26[%c0_84, %c0_85] : memref<8x128xf32, #tpu.memory_space<vmem>>, vector<8x128xf32>
    tpu.vector_store %arg26[%c0_84, %c0_85], %116 {strides = array<i32>} : memref<8x128xf32, #tpu.memory_space<vmem>>, vector<8x128xf32>,
    return
  }
}

</mosaic_0001>

<bundles_post_ra>
// kernel: tile.8
= control target key start
LH: loop header
LB: loop body
LE: loop exit
PB: predicated region body
PF: predicated region fallthrough
CT: control target
= control target key end

     0   :  { %s22_s0 = inlined_call_operand.vmem [shape: f32[8], index: 0, kind: input, shape index: {}]   ;;  %s23_s1 = inlined_call_operand.vmem [shape: f32[3,8], index: 1, kind: output, shape index: {}]  }
   0x1   :  { %v4_v0 = vld [vmem:[%s22_s0] ss:$0 sm:$0xff] }
   0x2   :  { %5 = vst [vmem:[%s23_s1] sm:$0xf] %v4_v0 }

// kernel: tile.9
= control target key start
LH: loop header
LB: loop body
LE: loop exit
PB: predicated region body
PF: predicated region fallthrough
CT: control target
= control target key end

     0   :  { %vm7_vm0 = vcmask 64512   ;;  %s30_s8 = smov 8   ;;  %vm13_vm1 = vcmask 195712   ;;  %vm19_vm2 = vcmask 130112   ;;  %s47_s0 = inlined_call_operand.vmem [shape: f32[3,8], index: 0, kind: input, shape index: {}]   ;;  %s48_s1 = inlined_call_operand.vmem [shape: f32[1,24], index: 1, kind: output, shape index: {}]  }
   0x1   :  { %v4_v0 = vld [vmem:[%s47_s0] sm:$0xf]  ;;  %s29_s0 = smov 16  }
   0x2   :  { %5 = vst [vmem:[#allocation1] sm:$0xf] %v4_v0 }
   0x9   :  { %v10_v1 = vld [vmem:[#allocation1 + $0x2] sm:$0x1]   ;;  %v6_v2 = vld [vmem:[#allocation1] sm:$0x1]   ;;  %v16_v3 = vld [vmem:[#allocation1 + $0x1] sm:$0x1]  }
   0xa   :  { %11 = vrot.lane.b32.xlu0 %v10_v1, %s29_s0  ;;  %8 = vst.msk [vmem:[#allocation0] sm:$0x1] %vm7_vm0, %v6_v2  }
   0xe   :  { %17 = vrot.lane.b32.xlu0 %v16_v3, %s30_s8 }
  0x7c   :  { %v12_v4 = vpop.permute.xlu0 %11  }
  0x7d   :  { %14 = vst.msk [vmem:[#allocation0] sm:$0x1] %vm13_vm1, %v12_v4  }
  0x80   :  { %v18_v5 = vpop.permute.xlu0 %17  }
  0x81   :  { %20 = vst.msk [vmem:[#allocation0] sm:$0x1] %vm19_vm2, %v18_v5  }
  0x88   :  { %v24_v6 = vld [vmem:[#allocation0] sm:$0x1] }
  0x89   :  { %26 = vst [vmem:[%s48_s1] sm:$0x1] %v24_v6 }

// kernel: mgcat_forward.1
= control target key start
LH: loop header
LB: loop body
LE: loop exit
PB: predicated region body
PF: predicated region fallthrough
CT: control target
= control target key end

     0   :  { %s4529_s0 = inlined_call_operand.vmem [shape: f32[8,128], index: 0, kind: input, shape index: {}]   ;;  %s4530_s1 = inlined_call_operand.vmem [shape: f32[8,128], index: 1, kind: input, shape index: {}]   ;;  %s4531_s2 = inlined_call_operand.vmem [shape: f32[8,128], index: 2, kind: input, shape index: {}]   ;;  %s4532_s3 = inlined_call_operand.hbm [shape: f32[128,128], index: 3, kind: input, shape index: {}]   ;;  %s4533_s4 = inlined_call_operand.hbm [shape: f32[1,128], index: 4, kind: input, shape index: {}]   ;;  %s4534_s5 = inlined_call_operand.vmem [shape: f32[128,128], index: 5, kind: input, shape index: {}]   ;;  %s4535_s6 = inlined_call_operand.hbm [shape: f32[1,128], index: 6, kind: input, shape index: {}]   ;;  %s4536_s7 = inlined_call_operand.hbm [shape: f32[128,128], index: 7, kind: input, shape index: {}]   ;;  %s4537_s8 = inlined_call_operand.hbm [shape: f32[1,128], index: 8, kind: input, shape index: {}]   ;;  %s4538_s9 = inlined_call_operand.vmem [shape: f32[1,24], index: 9, kind: input, shape index: {}]   ;;  %s4539_s10 = inlined_call_operand.hbm [shape: f32[128,384], index: 10, kind: input, shape index: {}]   ;;  %s4540_s11 = inlined_call_operand.hbm [shape: f32[1,384], index: 11, kind: input, shape index: {}]   ;;  %s4541_s12 = inlined_call_operand.hbm [shape: f32[128,384], index: 12, kind: input, shape index: {}]   ;;  %s4542_s13 = inlined_call_operand.hbm [shape: f32[1,384], index: 13, kind: input, shape index: {}]   ;;  %s4543_s14 = inlined_call_operand.hbm [shape: f32[3,128,128], index: 14, kind: input, shape index: {}]   ;;  %s4544_s15 = inlined_call_operand.hbm [shape: f32[1,128], index: 15, kind: input, shape index: {}]   ;;  %s4545_s16 = inlined_call_operand.hbm [shape: f32[128,128], index: 16, kind: input, shape index: {}]   ;;  %s4546_s17 = inlined_call_operand.hbm [shape: f32[1,128], index: 17, kind: input, shape index: {}]   ;;  %s4547_s18 = inlined_call_operand.hbm [shape: f32[128,128], index: 18, kind: input, shape index: {}]   ;;  %s4548_s19 = inlined_call_operand.hbm [shape: f32[1,128], index: 19, kind: input, shape index: {}]   ;;  %s4549_s20 = inlined_call_operand.hbm [shape: f32[128,128], index: 20, kind: input, shape index: {}]   ;;  %s4550_s21 = inlined_call_operand.hbm [shape: f32[1,128], index: 21, kind: input, shape index: {}]   ;;  %s4551_s22 = inlined_call_operand.hbm [shape: f32[128,128], index: 22, kind: input, shape index: {}]   ;;  %s4552_s23 = inlined_call_operand.hbm [shape: f32[1,128], index: 23, kind: input, shape index: {}]   ;;  %s4553_s24 = inlined_call_operand.vmem [shape: f32[8,384], index: 24, kind: output, shape index: {0}]   ;;  %s4554_s25 = inlined_call_operand.hbm [shape: f32[8,128], index: 25, kind: output, shape index: {1}]   ;;  %s4555_s26 = inlined_call_operand.hbm [shape: f32[8,128], index: 26, kind: output, shape index: {2}]  }
   0x1   :  { %4569 = sst [smem:[#allocation47_spill]] %s4529_s0 }
   0x2   :  { %4570 = sst [smem:[#allocation48_spill]] %s4530_s1 }
   0x3   :  { %4571 = sst [smem:[#allocation49_spill]] %s4531_s2 }
   0x4   :  { %4572 = sst [smem:[#allocation50_spill]] %s4532_s3 }
   0x5   :  { %4573 = sst [smem:[#allocation51_spill]] %s4533_s4 }
   0x6   :  { %4574 = sst [smem:[#allocation52_spill]] %s4534_s5 }
   0x7   :  { %4575 = sst [smem:[#allocation53_spill]] %s4535_s6 }
   0x8   :  { %4576 = sst [smem:[#allocation54_spill]] %s4536_s7 }
   0x9   :  { %4577 = sst [smem:[#allocation55_spill]] %s4537_s8 }
   0xa   :  { %4578 = sst [smem:[#allocation56_spill]] %s4538_s9 }
   0xb   :  { %4579 = sst [smem:[#allocation57_spill]] %s4539_s10 }
   0xc   :  { %4580 = sst [smem:[#allocation58_spill]] %s4554_s25 }
   0xd   :  { %4581 = sst [smem:[#allocation59_spill]] %s4555_s26 }
   0xe   :  { %32 = vsyncpa [#allocation3], 0 }
   0xf   :  { %33 = vsyncpa [#allocation6], 0 }
  0x10   :  { %34 = vsyncpa [#allocation9], 0 }
  0x11   :  { %35 = vsyncpa [#allocation12], 0 }
  0x12   :  { %36 = vsyncpa [#allocation15], 0 }
  0x13   :  { %37 = vsyncpa [#allocation18], 0 }
  0x14   :  { %38 = vsyncpa [#allocation21], 0 }
  0x15   :  { %39 = vsyncpa [#allocation24], 0 }
  0x16   :  { %40 = vsyncpa [#allocation27], 0 }
  0x17   :  { %41 = vsyncpa [#allocation30], 0 }
  0x18   :  { %42 = vsyncpa [#allocation4], 0 }
  0x19   :  { %43 = vsyncpa [#allocation34], 0  ;;  %s3815_s27 = smov [#allocation5]   ;;  %s4582_s8 = sld [smem:[#allocation51_spill]] }
  0x1a   :  { %s68_s3 = sshll.u32 %s3815_s27, 4  ;;  %s69_s3 = int_to_ptr.vmem [resolvable:$true] %s68_s3 }
  0x1f   :  { %s3329_s4 = scalar_lea.hbm %s4582_s8, 16 }
  0x20   :  { %p3330_p0 = scmp.ne.s32.totalorder %s4582_s8, %s3329_s4  ;;  %p3333_p1 = scmp.lt.u32.totalorder %s3329_s4, %s4582_s8 }
  0x22   :  { %p3335_p2 = pnand %p3333_p1, %p3330_p0 }
  0x24   :  { %3338 = shalt.err (!%p3335_p2)
}
  0x25   :  { %s3339_s2 = scalar_lea.vmem %s69_s3, 16  ;;  %s3343_s5 = scalar_lea.vmem %s69_s3, 32 }
  0x26   :  { %p3340_p3 = scmp.ne.s32.totalorder %s69_s3, %s3339_s2  ;;  %p3344_p4 = scmp.lt.s32.totalorder %s69_s3, %s69_s3 }
  0x27   :  { %p3345_p5 = scmp.lt.s32.totalorder %s3343_s5, %s3339_s2 }
  0x29   :  { %p3346_p6 = por %p3345_p5, %p3344_p4 }
  0x2b   :  { %p3347_p7 = pnand %p3346_p6, %p3340_p3 }
  0x2d   :  { %3350 = shalt.err (!%p3347_p7)
}
  0x2e   :  { %71 = dma.hbm_to_vmem [thread:$0]  %s4582_s8, 16, %s69_s3, [#allocation6]  }
  0x2f   :  { %s3816_s1 = smov [#allocation8]   ;;  %s3817_s7 = smov [#allocation11]  }
  0x30   :  { %s89_s27 = sshll.u32 %s3816_s1, 4  ;;  %s113_s28 = sshll.u32 %s3817_s7, 4  ;;  %s90_s27 = int_to_ptr.vmem [resolvable:$true] %s89_s27  ;;  %s114_s28 = int_to_ptr.vmem [resolvable:$true] %s113_s28 }
  0x31   :  { %s4583_s0 = sld [smem:[#allocation54_spill]] }
  0x37   :  { %s3351_s9 = scalar_lea.hbm %s4583_s0, 2048 }
  0x38   :  { %p3352_p8 = scmp.ne.s32.totalorder %s4583_s0, %s3351_s9  ;;  %p3355_p9 = scmp.lt.u32.totalorder %s3351_s9, %s4583_s0 }
  0x3a   :  { %p3357_p10 = pnand %p3355_p9, %p3352_p8 }
  0x3c   :  { %3360 = shalt.err (!%p3357_p10)
}
  0x3d   :  { %s3361_s3 = scalar_lea.vmem %s90_s27, 2048  ;;  %p3366_p12 = scmp.lt.s32.totalorder %s90_s27, %s90_s27 }
  0x3e   :  { %p3362_p11 = scmp.ne.s32.totalorder %s90_s27, %s3361_s3  ;;  %p3367_p13 = scmp.lt.s32.totalorder %s3361_s3, %s3361_s3 }
  0x40   :  { %p3368_p0 = por %p3367_p13, %p3366_p12 }
  0x42   :  { %p3369_p1 = pnand %p3368_p0, %p3362_p11 }
  0x44   :  { %3372 = shalt.err (!%p3369_p1)
}
  0x45   :  { %s4564_s8 = smov 128   ;;  %s4566_s10 = smov 8  }
  0x46   :  { %95 = dma.hbm_to_vmem [thread:$0]  %s4583_s0, 2048, %s90_s27, [#allocation9], %s4564_s8, %s4564_s8, %s4566_s10  }
  0x47   :  { %s4584_s4 = sld [smem:[#allocation57_spill]] }
  0x4d   :  { %s3373_s29 = scalar_lea.hbm %s4584_s4, 6144 }
  0x4e   :  { %p3374_p2 = scmp.ne.s32.totalorder %s4584_s4, %s3373_s29  ;;  %p3377_p3 = scmp.lt.u32.totalorder %s3373_s29, %s4584_s4 }
  0x50   :  { %p3379_p4 = pnand %p3377_p3, %p3374_p2 }
  0x52   :  { %3382 = shalt.err (!%p3379_p4)
}
  0x53   :  { %s3383_s3 = scalar_lea.vmem %s114_s28, 6144  ;;  %p3388_p6 = scmp.lt.s32.totalorder %s114_s28, %s114_s28 }
  0x54   :  { %p3384_p5 = scmp.ne.s32.totalorder %s114_s28, %s3383_s3  ;;  %p3389_p7 = scmp.lt.s32.totalorder %s3383_s3, %s3383_s3 }
  0x56   :  { %p3390_p8 = por %p3389_p7, %p3388_p6 }
  0x58   :  { %p3391_p9 = pnand %p3390_p8, %p3384_p5 }
  0x5a   :  { %3394 = shalt.err (!%p3391_p9)
}
  0x5b   :  { %s3820_s27 = smov 384   ;;  %s3821_s0 = smov 24  }
  0x5c   :  { %119 = dma.hbm_to_vmem [thread:$0]  %s4584_s4, 6144, %s114_s28, [#allocation12], %s3820_s27, %s3820_s27, %s3821_s0  }
  0x5d   :  { %s3822_s1 = smov [#allocation14]   ;;  %s3823_s9 = smov [#allocation17]  }
  0x5e   :  { %s135_s7 = sshll.u32 %s3822_s1, 4  ;;  %s157_s29 = sshll.u32 %s3823_s9, 4  ;;  %s136_s7 = int_to_ptr.vmem [resolvable:$true] %s135_s7  ;;  %s158_s29 = int_to_ptr.vmem [resolvable:$true] %s157_s29 }
  0x5f   :  { %s3395_s5 = scalar_lea.hbm %s4541_s12, 6144 }
  0x60   :  { %p3396_p10 = scmp.ne.s32.totalorder %s4541_s12, %s3395_s5  ;;  %p3399_p11 = scmp.lt.u32.totalorder %s3395_s5, %s4541_s12 }
  0x62   :  { %p3401_p12 = pnand %p3399_p11, %p3396_p10 }
  0x64   :  { %3404 = shalt.err (!%p3401_p12)
}
  0x65   :  { %s3405_s28 = scalar_lea.vmem %s136_s7, 6144  ;;  %p3410_p0 = scmp.lt.s32.totalorder %s136_s7, %s136_s7 }
  0x66   :  { %p3406_p13 = scmp.ne.s32.totalorder %s136_s7, %s3405_s28  ;;  %p3411_p1 = scmp.lt.s32.totalorder %s3405_s28, %s3405_s28 }
  0x68   :  { %p3412_p2 = por %p3411_p1, %p3410_p0 }
  0x6a   :  { %p3413_p3 = pnand %p3412_p2, %p3406_p13 }
  0x6c   :  { %3416 = shalt.err (!%p3413_p3)
}
  0x6d   :  { %141 = dma.hbm_to_vmem [thread:$0]  %s4541_s12, 6144, %s136_s7, [#allocation15], %s3820_s27, %s3820_s27, %s3821_s0  }
  0x6e   :  { %s3417_s1 = scalar_lea.hbm %s4543_s14, 6144 }
  0x6f   :  { %p3418_p4 = scmp.ne.s32.totalorder %s4543_s14, %s3417_s1  ;;  %p3421_p5 = scmp.lt.u32.totalorder %s3417_s1, %s4543_s14 }
  0x71   :  { %p3423_p6 = pnand %p3421_p5, %p3418_p4 }
  0x73   :  { %3426 = shalt.err (!%p3423_p6)
}
  0x74   :  { %s3427_s2 = scalar_lea.vmem %s158_s29, 6144  ;;  %p3432_p8 = scmp.lt.s32.totalorder %s158_s29, %s158_s29 }
  0x75   :  { %p3428_p7 = scmp.ne.s32.totalorder %s158_s29, %s3427_s2  ;;  %p3433_p9 = scmp.lt.s32.totalorder %s3427_s2, %s3427_s2 }
  0x77   :  { %p3434_p10 = por %p3433_p9, %p3432_p8 }
  0x79   :  { %p3435_p11 = pnand %p3434_p10, %p3428_p7 }
  0x7b   :  { %3438 = shalt.err (!%p3435_p11)
}
  0x7c   :  { %s4585_s12 = smov 8   ;;  %s4586_s27 = smov 128  }
  0x7d   :  { %163 = dma.hbm_to_vmem [thread:$0]  %s4543_s14, 6144, %s158_s29, [#allocation18], %s4586_s27, %s4586_s27, %s4585_s12  }
  0x7e   :  { %s3824_s5 = smov [#allocation20]   ;;  %s3825_s28 = smov [#allocation23]  }
  0x7f   :  { %s179_s3 = sshll.u32 %s3824_s5, 4  ;;  %s201_s4 = sshll.u32 %s3825_s28, 4  ;;  %s180_s3 = int_to_ptr.vmem [resolvable:$true] %s179_s3  ;;  %s202_s4 = int_to_ptr.vmem [resolvable:$true] %s201_s4 }
  0x80   :  { %s3439_s6 = scalar_lea.hbm %s4545_s16, 2048 }
  0x81   :  { %p3440_p12 = scmp.ne.s32.totalorder %s4545_s16, %s3439_s6  ;;  %p3443_p13 = scmp.lt.u32.totalorder %s3439_s6, %s4545_s16 }
  0x83   :  { %p3445_p0 = pnand %p3443_p13, %p3440_p12 }
  0x85   :  { %3448 = shalt.err (!%p3445_p0)
}
  0x86   :  { %s3449_s14 = scalar_lea.vmem %s180_s3, 2048  ;;  %p3454_p2 = scmp.lt.s32.totalorder %s180_s3, %s180_s3 }
  0x87   :  { %p3450_p1 = scmp.ne.s32.totalorder %s180_s3, %s3449_s14  ;;  %p3455_p3 = scmp.lt.s32.totalorder %s3449_s14, %s3449_s14 }
  0x89   :  { %p3456_p4 = por %p3455_p3, %p3454_p2 }
  0x8b   :  { %p3457_p5 = pnand %p3456_p4, %p3450_p1 }
  0x8d   :  { %3460 = shalt.err (!%p3457_p5)
}
  0x8e   :  { %185 = dma.hbm_to_vmem [thread:$0]  %s4545_s16, 2048, %s180_s3, [#allocation21], %s4586_s27, %s4586_s27, %s4585_s12  }
  0x8f   :  { %s3461_s7 = scalar_lea.hbm %s4547_s18, 2048 }
  0x90   :  { %p3462_p6 = scmp.ne.s32.totalorder %s4547_s18, %s3461_s7  ;;  %p3465_p7 = scmp.lt.u32.totalorder %s3461_s7, %s4547_s18 }
  0x92   :  { %p3467_p8 = pnand %p3465_p7, %p3462_p6 }
  0x94   :  { %3470 = shalt.err (!%p3467_p8)
}
  0x95   :  { %s3471_s6 = scalar_lea.vmem %s202_s4, 2048  ;;  %p3476_p10 = scmp.lt.s32.totalorder %s202_s4, %s202_s4 }
  0x96   :  { %p3472_p9 = scmp.ne.s32.totalorder %s202_s4, %s3471_s6  ;;  %p3477_p11 = scmp.lt.s32.totalorder %s3471_s6, %s3471_s6 }
  0x98   :  { %p3478_p12 = por %p3477_p11, %p3476_p10 }
  0x9a   :  { %p3479_p13 = pnand %p3478_p12, %p3472_p9 }
  0x9c   :  { %3482 = shalt.err (!%p3479_p13)
}
  0x9d   :  { %207 = dma.hbm_to_vmem [thread:$0]  %s4547_s18, 2048, %s202_s4, [#allocation24], %s4586_s27, %s4586_s27, %s4585_s12  }
  0x9e   :  { %s3826_s1 = smov [#allocation26]   ;;  %s3827_s10 = smov [#allocation29]  }
  0x9f   :  { %s223_s25 = sshll.u32 %s3826_s1, 4  ;;  %s245_s9 = sshll.u32 %s3827_s10, 4  ;;  %s224_s25 = int_to_ptr.vmem [resolvable:$true] %s223_s25  ;;  %s246_s9 = int_to_ptr.vmem [resolvable:$true] %s245_s9 }
  0xa0   :  { %s3483_s30 = scalar_lea.hbm %s4549_s20, 2048 }
  0xa1   :  { %p3484_p0 = scmp.ne.s32.totalorder %s4549_s20, %s3483_s30  ;;  %p3487_p1 = scmp.lt.u32.totalorder %s3483_s30, %s4549_s20 }
  0xa3   :  { %p3489_p2 = pnand %p3487_p1, %p3484_p0 }
  0xa5   :  { %3492 = shalt.err (!%p3489_p2)
}
  0xa6   :  { %s3493_s18 = scalar_lea.vmem %s224_s25, 2048  ;;  %p3498_p4 = scmp.lt.s32.totalorder %s224_s25, %s224_s25 }
  0xa7   :  { %p3494_p3 = scmp.ne.s32.totalorder %s224_s25, %s3493_s18  ;;  %p3499_p5 = scmp.lt.s32.totalorder %s3493_s18, %s3493_s18 }
  0xa9   :  { %p3500_p6 = por %p3499_p5, %p3498_p4 }
  0xab   :  { %p3501_p7 = pnand %p3500_p6, %p3494_p3 }
  0xad   :  { %3504 = shalt.err (!%p3501_p7)
}
  0xae   :  { %229 = dma.hbm_to_vmem [thread:$0]  %s4549_s20, 2048, %s224_s25, [#allocation27], %s4586_s27, %s4586_s27, %s4585_s12  }
  0xaf   :  { %s3505_s6 = scalar_lea.hbm %s4551_s22, 2048 }
  0xb0   :  { %p3506_p8 = scmp.ne.s32.totalorder %s4551_s22, %s3505_s6  ;;  %p3509_p9 = scmp.lt.u32.totalorder %s3505_s6, %s4551_s22 }
  0xb2   :  { %p3511_p10 = pnand %p3509_p9, %p3506_p8 }
  0xb4   :  { %3514 = shalt.err (!%p3511_p10)
}
  0xb5   :  { %s3515_s14 = scalar_lea.vmem %s246_s9, 2048  ;;  %p3520_p12 = scmp.lt.s32.totalorder %s246_s9, %s246_s9 }
  0xb6   :  { %p3516_p11 = scmp.ne.s32.totalorder %s246_s9, %s3515_s14  ;;  %p3521_p13 = scmp.lt.s32.totalorder %s3515_s14, %s3515_s14 }
  0xb8   :  { %p3522_p0 = por %p3521_p13, %p3520_p12 }
  0xba   :  { %p3523_p1 = pnand %p3522_p0, %p3516_p11 }
  0xbc   :  { %3526 = shalt.err (!%p3523_p1)
}
  0xbd   :  { %251 = dma.hbm_to_vmem [thread:$0]  %s4551_s22, 2048, %s246_s9, [#allocation30], %s4586_s27, %s4586_s27, %s4585_s12  }
  0xbe   :  { %s3828_s29 = smov [#allocation2]   ;;  %s3829_s2 = smov [#allocation7]  }
  0xbf   :  { %s55_s30 = sshll.u32 %s3828_s29, 4  ;;  %s80_s0 = sshll.u32 %s3829_s2, 4  ;;  %s56_s30 = int_to_ptr.vmem [resolvable:$true] %s55_s30  ;;  %s81_s0 = int_to_ptr.vmem [resolvable:$true] %s80_s0 }
  0xc0   :  { %s4587_s18 = sld [smem:[#allocation50_spill]] }
  0xc6   :  { %s3527_s4 = scalar_lea.hbm %s4587_s18, 2048 }
  0xc7   :  { %p3528_p2 = scmp.ne.s32.totalorder %s4587_s18, %s3527_s4  ;;  %p3531_p3 = scmp.lt.u32.totalorder %s3527_s4, %s4587_s18 }
  0xc9   :  { %p3533_p4 = pnand %p3531_p3, %p3528_p2 }
  0xcb   :  { %3536 = shalt.err (!%p3533_p4)
}
  0xcc   :  { %s3537_s22 = scalar_lea.vmem %s56_s30, 2048  ;;  %p3542_p6 = scmp.lt.s32.totalorder %s56_s30, %s56_s30 }
  0xcd   :  { %p3538_p5 = scmp.ne.s32.totalorder %s56_s30, %s3537_s22  ;;  %p3543_p7 = scmp.lt.s32.totalorder %s3537_s22, %s3537_s22 }
  0xcf   :  { %p3544_p8 = por %p3543_p7, %p3542_p6 }
  0xd1   :  { %p3545_p9 = pnand %p3544_p8, %p3538_p5 }
  0xd3   :  { %3548 = shalt.err (!%p3545_p9)
}
  0xd4   :  { %61 = dma.hbm_to_vmem [thread:$0]  %s4587_s18, 2048, %s56_s30, [#allocation3], %s4586_s27, %s4586_s27, %s4585_s12  }
  0xd5   :  { %s4588_s10 = sld [smem:[#allocation53_spill]] }
  0xdb   :  { %s3549_s14 = scalar_lea.hbm %s4588_s10, 16 }
  0xdc   :  { %p3550_p10 = scmp.ne.s32.totalorder %s4588_s10, %s3549_s14  ;;  %p3553_p11 = scmp.lt.u32.totalorder %s3549_s14, %s4588_s10 }
  0xde   :  { %p3555_p12 = pnand %p3553_p11, %p3550_p10 }
  0xe0   :  { %3558 = shalt.err (!%p3555_p12)
}
  0xe1   :  { %s3559_s7 = scalar_lea.vmem %s81_s0, 16  ;;  %s3563_s5 = scalar_lea.vmem %s81_s0, 32 }
  0xe2   :  { %p3560_p13 = scmp.ne.s32.totalorder %s81_s0, %s3559_s7  ;;  %p3564_p0 = scmp.lt.s32.totalorder %s81_s0, %s81_s0 }
  0xe3   :  { %p3565_p1 = scmp.lt.s32.totalorder %s3563_s5, %s3559_s7 }
  0xe5   :  { %p3566_p2 = por %p3565_p1, %p3564_p0 }
  0xe7   :  { %p3567_p3 = pnand %p3566_p2, %p3560_p13 }
  0xe9   :  { %3570 = shalt.err (!%p3567_p3)
}
  0xea   :  { %83 = dma.hbm_to_vmem [thread:$0]  %s4588_s10, 16, %s81_s0, [#allocation6]  }
  0xeb   :  { %s3830_s30 = smov [#allocation10]   ;;  %s3831_s4 = smov [#allocation13]  }
  0xec   :  { %s102_s18 = sshll.u32 %s3830_s30, 4  ;;  %s126_s28 = sshll.u32 %s3831_s4, 4  ;;  %s103_s18 = int_to_ptr.vmem [resolvable:$true] %s102_s18  ;;  %s127_s28 = int_to_ptr.vmem [resolvable:$true] %s126_s28 }
  0xed   :  { %s4589_s6 = sld [smem:[#allocation55_spill]] }
  0xf3   :  { %s3571_s22 = scalar_lea.hbm %s4589_s6, 16 }
  0xf4   :  { %p3572_p4 = scmp.ne.s32.totalorder %s4589_s6, %s3571_s22  ;;  %p3575_p5 = scmp.lt.u32.totalorder %s3571_s22, %s4589_s6 }
  0xf6   :  { %p3577_p6 = pnand %p3575_p5, %p3572_p4 }
  0xf8   :  { %3580 = shalt.err (!%p3577_p6)
}
  0xf9   :  { %s3581_s0 = scalar_lea.vmem %s103_s18, 16  ;;  %s3585_s10 = scalar_lea.vmem %s103_s18, 32 }
  0xfa   :  { %p3582_p7 = scmp.ne.s32.totalorder %s103_s18, %s3581_s0  ;;  %p3586_p8 = scmp.lt.s32.totalorder %s103_s18, %s103_s18 }
  0xfb   :  { %p3587_p9 = scmp.lt.s32.totalorder %s3585_s10, %s3581_s0 }
  0xfd   :  { %p3588_p10 = por %p3587_p9, %p3586_p8 }
  0xff   :  { %p3589_p11 = pnand %p3588_p10, %p3582_p7 }
 0x101   :  { %3592 = shalt.err (!%p3589_p11)
}
 0x102   :  { %105 = dma.hbm_to_vmem [thread:$0]  %s4589_s6, 16, %s103_s18, [#allocation9]  }
 0x103   :  { %s3593_s2 = scalar_lea.hbm %s4540_s11, 48 }
 0x104   :  { %p3594_p12 = scmp.ne.s32.totalorder %s4540_s11, %s3593_s2  ;;  %p3597_p13 = scmp.lt.u32.totalorder %s3593_s2, %s4540_s11 }
 0x106   :  { %p3599_p0 = pnand %p3597_p13, %p3594_p12 }
 0x108   :  { %3602 = shalt.err (!%p3599_p0)
}
 0x109   :  { %s3603_s30 = scalar_lea.vmem %s127_s28, 48  ;;  %s3607_s4 = scalar_lea.vmem %s127_s28, 64 }
 0x10a   :  { %p3604_p1 = scmp.ne.s32.totalorder %s127_s28, %s3603_s30  ;;  %p3608_p2 = scmp.lt.s32.totalorder %s127_s28, %s127_s28 }
 0x10b   :  { %p3609_p3 = scmp.lt.s32.totalorder %s3607_s4, %s3603_s30 }
 0x10d   :  { %p3610_p4 = por %p3609_p3, %p3608_p2 }
 0x10f   :  { %p3611_p5 = pnand %p3610_p4, %p3604_p1 }
 0x111   :  { %3614 = shalt.err (!%p3611_p5)
}
 0x112   :  { %129 = dma.hbm_to_vmem [thread:$0]  %s4540_s11, 48, %s127_s28, [#allocation12]  }
 0x113   :  { %s3832_s8 = smov [#allocation16]   ;;  %s3833_s22 = smov [#allocation19]  }
 0x114   :  { %s148_s6 = sshll.u32 %s3832_s8, 4  ;;  %s170_s9 = sshll.u32 %s3833_s22, 4  ;;  %s149_s6 = int_to_ptr.vmem [resolvable:$true] %s148_s6  ;;  %s171_s9 = int_to_ptr.vmem [resolvable:$true] %s170_s9 }
 0x115   :  { %s3615_s1 = scalar_lea.hbm %s4542_s13, 48 }
 0x116   :  { %p3616_p6 = scmp.ne.s32.totalorder %s4542_s13, %s3615_s1  ;;  %p3619_p7 = scmp.lt.u32.totalorder %s3615_s1, %s4542_s13 }
 0x118   :  { %p3621_p8 = pnand %p3619_p7, %p3616_p6 }
 0x11a   :  { %3624 = shalt.err (!%p3621_p8)
}
 0x11b   :  { %s3625_s11 = scalar_lea.vmem %s149_s6, 48  ;;  %s3629_s28 = scalar_lea.vmem %s149_s6, 64 }
 0x11c   :  { %p3626_p9 = scmp.ne.s32.totalorder %s149_s6, %s3625_s11  ;;  %p3630_p10 = scmp.lt.s32.totalorder %s149_s6, %s149_s6 }
 0x11d   :  { %p3631_p11 = scmp.lt.s32.totalorder %s3629_s28, %s3625_s11 }
 0x11f   :  { %p3632_p12 = por %p3631_p11, %p3630_p10 }
 0x121   :  { %p3633_p13 = pnand %p3632_p12, %p3626_p9 }
 0x123   :  { %3636 = shalt.err (!%p3633_p13)
}
 0x124   :  { %151 = dma.hbm_to_vmem [thread:$0]  %s4542_s13, 48, %s149_s6, [#allocation15]  }
 0x125   :  { %s3637_s5 = scalar_lea.hbm %s4544_s15, 16 }
 0x126   :  { %p3638_p0 = scmp.ne.s32.totalorder %s4544_s15, %s3637_s5  ;;  %p3641_p1 = scmp.lt.u32.totalorder %s3637_s5, %s4544_s15 }
 0x128   :  { %p3643_p2 = pnand %p3641_p1, %p3638_p0 }
 0x12a   :  { %3646 = shalt.err (!%p3643_p2)
}
 0x12b   :  { %s3647_s18 = scalar_lea.vmem %s171_s9, 16  ;;  %s3651_s26 = scalar_lea.vmem %s171_s9, 32 }
 0x12c   :  { %p3648_p3 = scmp.ne.s32.totalorder %s171_s9, %s3647_s18  ;;  %p3652_p4 = scmp.lt.s32.totalorder %s171_s9, %s171_s9 }
 0x12d   :  { %p3653_p5 = scmp.lt.s32.totalorder %s3651_s26, %s3647_s18 }
 0x12f   :  { %p3654_p6 = por %p3653_p5, %p3652_p4 }
 0x131   :  { %p3655_p7 = pnand %p3654_p6, %p3648_p3 }
 0x133   :  { %3658 = shalt.err (!%p3655_p7)
}
 0x134   :  { %173 = dma.hbm_to_vmem [thread:$0]  %s4544_s15, 16, %s171_s9, [#allocation18]  }
 0x135   :  { %s3834_s6 = smov [#allocation22]   ;;  %s3835_s16 = smov [#allocation25]  }
 0x136   :  { %s192_s22 = sshll.u32 %s3834_s6, 4  ;;  %s214_s3 = sshll.u32 %s3835_s16, 4  ;;  %s193_s22 = int_to_ptr.vmem [resolvable:$true] %s192_s22  ;;  %s215_s3 = int_to_ptr.vmem [resolvable:$true] %s214_s3 }
 0x137   :  { %s3659_s10 = scalar_lea.hbm %s4546_s17, 16 }
 0x138   :  { %p3660_p8 = scmp.ne.s32.totalorder %s4546_s17, %s3659_s10  ;;  %p3663_p9 = scmp.lt.u32.totalorder %s3659_s10, %s4546_s17 }
 0x13a   :  { %p3665_p10 = pnand %p3663_p9, %p3660_p8 }
 0x13c   :  { %3668 = shalt.err (!%p3665_p10)
}
 0x13d   :  { %s3669_s15 = scalar_lea.vmem %s193_s22, 16  ;;  %s3673_s9 = scalar_lea.vmem %s193_s22, 32 }
 0x13e   :  { %p3670_p11 = scmp.ne.s32.totalorder %s193_s22, %s3669_s15  ;;  %p3674_p12 = scmp.lt.s32.totalorder %s193_s22, %s193_s22 }
 0x13f   :  { %p3675_p13 = scmp.lt.s32.totalorder %s3673_s9, %s3669_s15 }
 0x141   :  { %p3676_p0 = por %p3675_p13, %p3674_p12 }
 0x143   :  { %p3677_p1 = pnand %p3676_p0, %p3670_p11 }
 0x145   :  { %3680 = shalt.err (!%p3677_p1)
}
 0x146   :  { %195 = dma.hbm_to_vmem [thread:$0]  %s4546_s17, 16, %s193_s22, [#allocation21]  }
 0x147   :  { %s3681_s5 = scalar_lea.hbm %s4548_s19, 16 }
 0x148   :  { %p3682_p2 = scmp.ne.s32.totalorder %s4548_s19, %s3681_s5  ;;  %p3685_p3 = scmp.lt.u32.totalorder %s3681_s5, %s4548_s19 }
 0x14a   :  { %p3687_p4 = pnand %p3685_p3, %p3682_p2 }
 0x14c   :  { %3690 = shalt.err (!%p3687_p4)
}
 0x14d   :  { %s3691_s18 = scalar_lea.vmem %s215_s3, 16  ;;  %s3695_s26 = scalar_lea.vmem %s215_s3, 32 }
 0x14e   :  { %p3692_p5 = scmp.ne.s32.totalorder %s215_s3, %s3691_s18  ;;  %p3696_p6 = scmp.lt.s32.totalorder %s215_s3, %s215_s3 }
 0x14f   :  { %p3697_p7 = scmp.lt.s32.totalorder %s3695_s26, %s3691_s18 }
 0x151   :  { %p3698_p8 = por %p3697_p7, %p3696_p6 }
 0x153   :  { %p3699_p9 = pnand %p3698_p8, %p3692_p5 }
 0x155   :  { %3702 = shalt.err (!%p3699_p9)
}
 0x156   :  { %217 = dma.hbm_to_vmem [thread:$0]  %s4548_s19, 16, %s215_s3, [#allocation24]  }
 0x157   :  { %s3836_s8 = smov [#allocation28]   ;;  %s3837_s22 = smov [#allocation31]  }
 0x158   :  { %s236_s6 = sshll.u32 %s3836_s8, 4  ;;  %s258_s16 = sshll.u32 %s3837_s22, 4  ;;  %s237_s6 = int_to_ptr.vmem [resolvable:$true] %s236_s6  ;;  %s259_s16 = int_to_ptr.vmem [resolvable:$true] %s258_s16 }
 0x159   :  { %s3703_s10 = scalar_lea.hbm %s4550_s21, 16 }
 0x15a   :  { %p3704_p10 = scmp.ne.s32.totalorder %s4550_s21, %s3703_s10  ;;  %p3707_p11 = scmp.lt.u32.totalorder %s3703_s10, %s4550_s21 }
 0x15c   :  { %p3709_p12 = pnand %p3707_p11, %p3704_p10 }
 0x15e   :  { %3712 = shalt.err (!%p3709_p12)
}
 0x15f   :  { %s3713_s19 = scalar_lea.vmem %s237_s6, 16  ;;  %s3717_s3 = scalar_lea.vmem %s237_s6, 32 }
 0x160   :  { %p3714_p13 = scmp.ne.s32.totalorder %s237_s6, %s3713_s19  ;;  %p3718_p0 = scmp.lt.s32.totalorder %s237_s6, %s237_s6 }
 0x161   :  { %p3719_p1 = scmp.lt.s32.totalorder %s3717_s3, %s3713_s19 }
 0x163   :  { %p3720_p2 = por %p3719_p1, %p3718_p0 }
 0x165   :  { %p3721_p3 = pnand %p3720_p2, %p3714_p13 }
 0x167   :  { %3724 = shalt.err (!%p3721_p3)
}
 0x168   :  { %239 = dma.hbm_to_vmem [thread:$0]  %s4550_s21, 16, %s237_s6, [#allocation27]  }
 0x169   :  { %s3725_s2 = scalar_lea.hbm %s4552_s23, 16 }
 0x16a   :  { %p3726_p4 = scmp.ne.s32.totalorder %s4552_s23, %s3725_s2  ;;  %p3729_p5 = scmp.lt.u32.totalorder %s3725_s2, %s4552_s23 }
 0x16c   :  { %p3731_p6 = pnand %p3729_p5, %p3726_p4 }
 0x16e   :  { %3734 = shalt.err (!%p3731_p6)
}
 0x16f   :  { %s3735_s30 = scalar_lea.vmem %s259_s16, 16  ;;  %s3739_s4 = scalar_lea.vmem %s259_s16, 32 }
 0x170   :  { %p3736_p7 = scmp.ne.s32.totalorder %s259_s16, %s3735_s30  ;;  %p3740_p8 = scmp.lt.s32.totalorder %s259_s16, %s259_s16 }
 0x171   :  { %p3741_p9 = scmp.lt.s32.totalorder %s3739_s4, %s3735_s30 }
 0x173   :  { %p3742_p10 = por %p3741_p9, %p3740_p8 }
 0x175   :  { %p3743_p11 = pnand %p3742_p10, %p3736_p7 }
 0x177   :  { %3746 = shalt.err (!%p3743_p11)
}
 0x178   :  { %261 = dma.hbm_to_vmem [thread:$0]  %s4552_s23, 16, %s259_s16, [#allocation30]  }
 0x179   :  { %3791 = dma.done.wait [#allocation3], 2048  }
 0x17a   :  { %3792 = vsyncadd [#allocation3], 4294965248 }
 0x17b   :  { %3793 = dma.done.wait [#allocation6], 32  }
 0x17c   :  { %3794 = vsyncadd [#allocation6], 4294967264 }
 0x17d   :  { %3795 = dma.done.wait [#allocation9], 2064  }
 0x17e   :  { %3796 = vsyncadd [#allocation9], 4294965232 }
 0x17f   :  { %3797 = dma.done.wait [#allocation12], 6192  }
 0x180   :  { %3798 = vsyncadd [#allocation12], 4294961104 }
 0x181   :  { %3799 = dma.done.wait [#allocation15], 6192  }
 0x182   :  { %3800 = vsyncadd [#allocation15], 4294961104 }
 0x183   :  { %3801 = dma.done.wait [#allocation18], 6160  }
 0x184   :  { %3802 = vsyncadd [#allocation18], 4294961136 }
 0x185   :  { %3803 = dma.done.wait [#allocation21], 2064  }
 0x186   :  { %3804 = vsyncadd [#allocation21], 4294965232 }
 0x187   :  { %3805 = dma.done.wait [#allocation24], 2064  }
 0x188   :  { %3806 = vsyncadd [#allocation24], 4294965232 }
 0x189   :  { %3807 = dma.done.wait [#allocation27], 2064  }
 0x18a   :  { %3808 = vsyncadd [#allocation27], 4294965232 }
 0x18b   :  { %3809 = dma.done.wait [#allocation30], 2064  }
 0x18c   :  { %3810 = vsyncadd [#allocation30], 4294965232  ;;  %v3838_v0 = vmov 0.0|0.0   ;;  %vm3839_vm0 = vmmov 0   ;;  %v3840_v1 = vmov 0.0   ;;  %v320_v2 = vld [vmem:[#allocation2] sm:$0xff] }
 0x18d   :  { %2913 = vmatprep.subr.bf16.mxu0 %v3838_v0  ;;  %2937 = vmatprep.subr.bf16.mxu1 %v3838_v0  ;;  %v321_v3 = vld [vmem:[#allocation2 + $0x8] sm:$0xff]  ;;  %v322_v4 = vld [vmem:[#allocation2 + $0x10] sm:$0xff]  ;;  %v323_v6 = vld [vmem:[#allocation2 + $0x18] sm:$0xff]  ;;  %s4590_s17 = sld [smem:[#allocation52_spill]]  ;;  %s4591_s22 = sld [smem:[#allocation47_spill]]  ;;  %vm922_vm1 = vcmask 195584  }
 0x18e   :  { %2453 = vmatprep.mubr.msk.f32.mxu0 %vm3839_vm0, %v3840_v1  ;;  %2488 = vmatprep.mubr.msk.f32.mxu1 %vm3839_vm0, %v3840_v1  ;;  %v2914_v5 = vpack.c.bf16 %v321_v3, %v320_v2  ;;  %v2917_v11 = vpack.c.bf16 %v323_v6, %v322_v4  ;;  %v324_v13 = vld [vmem:[#allocation2 + $0x20] sm:$0xff]  ;;  %v325_v14 = vld [vmem:[#allocation2 + $0x28] sm:$0xff]  ;;  %v326_v19 = vld [vmem:[#allocation2 + $0x30] sm:$0xff]  ;;  %s4592_s1 = sld [smem:[#allocation48_spill]]  ;;  %s4593_s14 = sld [smem:[#allocation49_spill]] }
 0x18f   :  { %v2920_v18 = vpack.c.bf16 %v325_v14, %v324_v13  ;;  %v327_v20 = vld [vmem:[#allocation2 + $0x38] sm:$0xff]  ;;  %v328_v25 = vld [vmem:[#allocation2 + $0x40] sm:$0xff]  ;;  %v329_v26 = vld [vmem:[#allocation2 + $0x48] sm:$0xff]  ;;  %s4594_s28 = sld [smem:[#allocation56_spill]] }
 0x190   :  { %2915 = vmatpush3.bf16.msra.mxu0 %v2914_v5  ;;  %v2923_v24 = vpack.c.bf16 %v327_v20, %v326_v19  ;;  %v2926_v30 = vpack.c.bf16 %v329_v26, %v328_v25  ;;  %v330_v31 = vld [vmem:[#allocation2 + $0x50] sm:$0xff]  ;;  %v331_v32 = vld [vmem:[#allocation2 + $0x58] sm:$0xff]  ;;  %v332_v37 = vld [vmem:[#allocation2 + $0x60] sm:$0xff] }
 0x191   :  { %2916 = vmatprep.subr.bf16.mxu0 %v3838_v0  ;;  %v2929_v36 = vpack.c.bf16 %v331_v32, %v330_v31  ;;  %v333_v38 = vld [vmem:[#allocation2 + $0x68] sm:$0xff]  ;;  %v334_v43 = vld [vmem:[#allocation2 + $0x70] sm:$0xff]  ;;  %v335_v44 = vld [vmem:[#allocation2 + $0x78] sm:$0xff] }
 0x192   :  { %v2932_v42 = vpack.c.bf16 %v333_v38, %v332_v37  ;;  %v603_v48 = vld [vmem:[#allocation11 + $0x8] sm:$0xff]  ;;  %v606_v49 = vld [vmem:[#allocation11 + $0x20] sm:$0xff]  ;;  %v2935_v50 = vpack.c.bf16 %v335_v44, %v334_v43  ;;  %v605_v56 = vld [vmem:[#allocation11 + $0x18] sm:$0xff] }
 0x193   :  { %v414_v7 = vld [vmem:[%s4590_s17] sm:$0xff]  ;;  %v415_v8 = vld [vmem:[%s4590_s17 + $0x8] sm:$0xff]  ;;  %v416_v10 = vld [vmem:[%s4590_s17 + $0x10] sm:$0xff]  ;;  %v2985_v54 = vpack.c.bf16 %v606_v49, %v603_v48 }
 0x194   :  { %v2938_v9 = vpack.c.bf16 %v415_v8, %v414_v7  ;;  %v417_v12 = vld [vmem:[%s4590_s17 + $0x18] sm:$0xff]  ;;  %v418_v16 = vld [vmem:[%s4590_s17 + $0x20] sm:$0xff]  ;;  %v419_v17 = vld [vmem:[%s4590_s17 + $0x28] sm:$0xff]  ;;  %2918 = vmatpush3.bf16.msra.mxu0 %v2917_v11 }
 0x195   :  { %v2941_v15 = vpack.c.bf16 %v417_v12, %v416_v10  ;;  %2919 = vmatprep.subr.bf16.mxu0 %v3838_v0  ;;  %v2944_v21 = vpack.c.bf16 %v419_v17, %v418_v16  ;;  %v420_v22 = vld [vmem:[%s4590_s17 + $0x30] sm:$0xff]  ;;  %v421_v23 = vld [vmem:[%s4590_s17 + $0x38] sm:$0xff]  ;;  %v422_v28 = vld [vmem:[%s4590_s17 + $0x40] sm:$0xff] }
 0x196   :  { %2939 = vmatpush3.bf16.msra.mxu1 %v2938_v9  ;;  %v2947_v27 = vpack.c.bf16 %v421_v23, %v420_v22  ;;  %v423_v29 = vld [vmem:[%s4590_s17 + $0x48] sm:$0xff]  ;;  %v424_v34 = vld [vmem:[%s4590_s17 + $0x50] sm:$0xff]  ;;  %v425_v35 = vld [vmem:[%s4590_s17 + $0x58] sm:$0xff] }
 0x197   :  { %2940 = vmatprep.subr.bf16.mxu1 %v3838_v0  ;;  %v2950_v33 = vpack.c.bf16 %v423_v29, %v422_v28  ;;  %v2953_v39 = vpack.c.bf16 %v425_v35, %v424_v34  ;;  %v426_v40 = vld [vmem:[%s4590_s17 + $0x60] sm:$0xff]  ;;  %v427_v41 = vld [vmem:[%s4590_s17 + $0x68] sm:$0xff]  ;;  %v428_v46 = vld [vmem:[%s4590_s17 + $0x70] sm:$0xff] }
 0x198   :  { %2921 = vmatpush3.bf16.msra.mxu0 %v2920_v18  ;;  %v2956_v45 = vpack.c.bf16 %v427_v41, %v426_v40  ;;  %v429_v47 = vld [vmem:[%s4590_s17 + $0x78] sm:$0xff]  ;;  %v508_v52 = vld [vmem:[#allocation8] sm:$0xff]  ;;  %v509_v53 = vld [vmem:[#allocation8 + $0x8] sm:$0xff] }
 0x199   :  { %2922 = vmatprep.subr.bf16.mxu0 %v3838_v0  ;;  %v2959_v51 = vpack.c.bf16 %v429_v47, %v428_v46  ;;  %v602_v55 = vld [vmem:[#allocation11] sm:$0xff]  ;;  %v2962_v58 = vpack.c.bf16 %v509_v53, %v508_v52  ;;  %v609_v59 = vld [vmem:[#allocation11 + $0x38] sm:$0xff]  ;;  %v612_v60 = vld [vmem:[#allocation11 + $0x50] sm:$0xff] }
 0x19a   :  { %2942 = vmatpush3.bf16.msra.mxu1 %v2941_v15  ;;  %v319_v57 = vld [vmem:[%s4591_s22] sm:$0xff]  ;;  %v510_v62 = vld [vmem:[#allocation8 + $0x10] sm:$0xff]  ;;  %v2987_v2 = vpack.c.bf16 %v605_v56, %v602_v55  ;;  %v2989_v3 = vpack.c.bf16 %v612_v60, %v609_v59  ;;  %v513_v10 = vld [vmem:[#allocation8 + $0x28] sm:$0xff] }
 0x19b   :  { %2943 = vmatprep.subr.bf16.mxu1 %v3838_v0  ;;  %v413_v61 = vld [vmem:[%s4592_s1] sm:$0xff]  ;;  %v608_v4 = vld [vmem:[#allocation11 + $0x30] sm:$0xff]  ;;  %v611_v5 = vld [vmem:[#allocation11 + $0x48] sm:$0xff] }
 0x19c   :  { %2924 = vmatpush3.bf16.msra.mxu0 %v2923_v24  ;;  %v511_v63 = vld [vmem:[#allocation8 + $0x18] sm:$0xff]  ;;  %v615_v7 = vld [vmem:[#allocation11 + $0x68] sm:$0xff]  ;;  %v618_v8 = vld [vmem:[#allocation11 + $0x80] sm:$0xff]  ;;  %v2991_v11 = vpack.c.bf16 %v611_v5, %v608_v4 }
 0x19d   :  { %2925 = vmatprep.subr.bf16.mxu0 %v3838_v0  ;;  %v2965_v6 = vpack.c.bf16 %v511_v63, %v510_v62  ;;  %v512_v9 = vld [vmem:[#allocation8 + $0x20] sm:$0xff]  ;;  %v2993_v12 = vpack.c.bf16 %v618_v8, %v615_v7  ;;  %v624_v17 = vld [vmem:[#allocation11 + $0xb0] sm:$0xff]  ;;  %v623_v23 = vld [vmem:[#allocation11 + $0xa8] sm:$0xff] }
 0x19e   :  { %2945 = vmatpush3.bf16.msra.mxu1 %v2944_v21  ;;  %v614_v13 = vld [vmem:[#allocation11 + $0x60] sm:$0xff]  ;;  %v617_v14 = vld [vmem:[#allocation11 + $0x78] sm:$0xff]  ;;  %v2968_v15 = vpack.c.bf16 %v513_v10, %v512_v9  ;;  %v514_v18 = vld [vmem:[#allocation8 + $0x30] sm:$0xff] }
 0x19f   :  { %2946 = vmatprep.subr.bf16.mxu1 %v3838_v0  ;;  %v621_v16 = vld [vmem:[#allocation11 + $0x98] sm:$0xff]  ;;  %v2995_v20 = vpack.c.bf16 %v617_v14, %v614_v13  ;;  %v620_v22 = vld [vmem:[#allocation11 + $0x90] sm:$0xff]  ;;  %v627_v25 = vld [vmem:[#allocation11 + $0xc8] sm:$0xff] }
 0x1a0   :  { %2927 = vmatpush3.bf16.msra.mxu0 %v2926_v30  ;;  %v515_v19 = vld [vmem:[#allocation8 + $0x38] sm:$0xff]  ;;  %v2997_v21 = vpack.c.bf16 %v624_v17, %v621_v16  ;;  %v630_v26 = vld [vmem:[#allocation11 + $0xe0] sm:$0xff]  ;;  %v2999_v29 = vpack.c.bf16 %v623_v23, %v620_v22  ;;  %v635_v41 = vld [vmem:[#allocation11 + $0x108] sm:$0xff] }
 0x1a1   :  { %2928 = vmatprep.subr.bf16.mxu0 %v3838_v0  ;;  %v2971_v24 = vpack.c.bf16 %v515_v19, %v514_v18  ;;  %v517_v28 = vld [vmem:[#allocation8 + $0x48] sm:$0xff]  ;;  %v3001_v30 = vpack.c.bf16 %v630_v26, %v627_v25  ;;  %v629_v32 = vld [vmem:[#allocation11 + $0xd8] sm:$0xff]  ;;  %v636_v35 = vld [vmem:[#allocation11 + $0x110] sm:$0xff] }
 0x1a2   :  { %2948 = vmatpush3.bf16.msra.mxu1 %v2947_v27  ;;  %v516_v27 = vld [vmem:[#allocation8 + $0x40] sm:$0xff]  ;;  %v519_v37 = vld [vmem:[#allocation8 + $0x58] sm:$0xff]  ;;  %v639_v43 = vld [vmem:[#allocation11 + $0x128] sm:$0xff] }
 0x1a3   :  { %2949 = vmatprep.subr.bf16.mxu1 %v3838_v0  ;;  %v626_v31 = vld [vmem:[#allocation11 + $0xc0] sm:$0xff]  ;;  %v633_v34 = vld [vmem:[#allocation11 + $0xf8] sm:$0xff]  ;;  %v632_v40 = vld [vmem:[#allocation11 + $0xf0] sm:$0xff] }
 0x1a4   :  { %2930 = vmatpush3.bf16.msra.mxu0 %v2929_v36  ;;  %v518_v36 = vld [vmem:[#allocation8 + $0x50] sm:$0xff]  ;;  %v3003_v38 = vpack.c.bf16 %v629_v32, %v626_v31  ;;  %v642_v44 = vld [vmem:[#allocation11 + $0x140] sm:$0xff]  ;;  %v3007_v47 = vpack.c.bf16 %v635_v41, %v632_v40  ;;  %v645_v52 = vld [vmem:[#allocation11 + $0x158] sm:$0xff] }
 0x1a5   :  { %2931 = vmatprep.subr.bf16.mxu0 %v3838_v0  ;;  %v521_v46 = vld [vmem:[#allocation8 + $0x68] sm:$0xff]  ;;  %v3009_v48 = vpack.c.bf16 %v642_v44, %v639_v43  ;;  %v648_v53 = vld [vmem:[#allocation11 + $0x170] sm:$0xff]  ;;  %v625_v8 = vld [vmem:[#allocation11 + $0xb8] sm:$0xff] }
 0x1a6   :  { %2951 = vmatpush3.bf16.msra.mxu1 %v2950_v33  ;;  %v2974_v33 = vpack.c.bf16 %v517_v28, %v516_v27  ;;  %v638_v49 = vld [vmem:[#allocation11 + $0x120] sm:$0xff]  ;;  %v523_v55 = vld [vmem:[#allocation8 + $0x78] sm:$0xff]  ;;  %v607_v60 = vld [vmem:[#allocation11 + $0x28] sm:$0xff] }
 0x1a7   :  { %2952 = vmatprep.subr.bf16.mxu1 %v3838_v0  ;;  %v604_v59 = vld [vmem:[#allocation11 + $0x10] sm:$0xff]  ;;  %v610_v63 = vld [vmem:[#allocation11 + $0x40] sm:$0xff]  ;;  %v619_v5 = vld [vmem:[#allocation11 + $0x88] sm:$0xff] }
 0x1a8   :  { %2933 = vmatpush3.bf16.msra.mxu0 %v2932_v42  ;;  %v2977_v42 = vpack.c.bf16 %v519_v37, %v518_v36  ;;  %v3018_v62 = vpack.c.bf16 %v607_v60, %v604_v59  ;;  %v616_v4 = vld [vmem:[#allocation11 + $0x70] sm:$0xff]  ;;  %v622_v7 = vld [vmem:[#allocation11 + $0xa0] sm:$0xff]  ;;  %v637_v14 = vld [vmem:[#allocation11 + $0x118] sm:$0xff]  ;;  %v652_v37 = vlaneseq }
 0x1a9   :  { %2934 = vmatprep.subr.bf16.mxu0 %v3838_v0  ;;  %v3027_v9 = vpack.c.bf16 %v625_v8, %v622_v7  ;;  %v628_v10 = vld [vmem:[#allocation11 + $0xd0] sm:$0xff]  ;;  %v634_v13 = vld [vmem:[#allocation11 + $0x100] sm:$0xff]  ;;  %v643_v17 = vld [vmem:[#allocation11 + $0x148] sm:$0xff] }
 0x1aa   :  { %2954 = vmatpush3.bf16.msra.mxu1 %v2953_v39  ;;  %v3005_v39 = vpack.c.bf16 %v636_v35, %v633_v34  ;;  %v640_v16 = vld [vmem:[#allocation11 + $0x130] sm:$0xff]  ;;  %v649_v23 = vld [vmem:[#allocation11 + $0x178] sm:$0xff]  ;;  %v650_v40 = vld [vmem:[#allocation13] sm:$0x7] }
 0x1ab   :  { %2955 = vmatprep.subr.bf16.mxu1 %v3838_v0  ;;  %v3036_v18 = vpack.c.bf16 %v643_v17, %v640_v16  ;;  %v644_v19 = vld [vmem:[#allocation11 + $0x150] sm:$0xff]  ;;  %v2174_v25 = vld [vmem:[#allocation5] ss:$0 sm:$0xff]  ;;  %v2175_v27 = vld [vmem:[#allocation7] ss:$0 sm:$0xff] }
 0x1ac   :  { %2936 = vmatpush3.bf16.msra.mxu0 %v2935_v50  ;;  %v641_v50 = vld [vmem:[#allocation11 + $0x138] sm:$0xff] }
 0x1ad   :  { %2961 = vmatprep.subr.bf16.mxu0 %v3838_v0  ;;  %v3011_v56 = vpack.c.bf16 %v641_v50, %v638_v49  ;;  %v4360_v8 = vld [vmem:[%s4594_s28] ss:$0 sm:$0xff] }
 0x1ae   :  { %2957 = vmatpush3.bf16.msra.mxu1 %v2956_v45  ;;  %v520_v45 = vld [vmem:[#allocation8 + $0x60] sm:$0xff] }
 0x1af   :  { %2958 = vmatprep.subr.bf16.mxu1 %v3838_v0  ;;  %2454 = vmatmul.mubr.f32.vlgmr.msra.gmra.mrb[0].mxu0 %v319_v57  ;;  %v3013_v57 = vpack.c.bf16 %v648_v53, %v645_v52 }
 0x1b0   :  { %2963 = vmatpush3.bf16.msra.mxu0 %v2962_v58  ;;  %2523 = vmatprep.mubr.msk.f32.mxu0 %vm3839_vm0, %v3840_v1 }
 0x1b1   :  { %2964 = vmatprep.subr.bf16.mxu0 %v3838_v0 }
 0x1b2   :  { %2960 = vmatpush3.bf16.msra.mxu1 %v2959_v51  ;;  %v2980_v51 = vpack.c.bf16 %v521_v46, %v520_v45 }
 0x1b3   :  { %2986 = vmatprep.subr.bf16.mxu1 %v2985_v54  ;;  %v522_v54 = vld [vmem:[#allocation8 + $0x70] sm:$0xff] }
 0x1b4   :  { %2966 = vmatpush3.bf16.msra.mxu0 %v2965_v6  ;;  %v2983_v58 = vpack.c.bf16 %v523_v55, %v522_v54  ;;  %v3024_v6 = vpack.c.bf16 %v619_v5, %v616_v4 }
 0x1b5   :  { %2489 = vmatmul.mubr.f32.vlgmr.msra.gmra.mrb[0].mxu1 %v413_v61  ;;  %2967 = vmatprep.subr.bf16.mxu0 %v3838_v0  ;;  %v507_v61 = vld [vmem:[%s4593_s14] sm:$0xff] }
 0x1b6   :  { %2988 = vmatpush1.bf16.msra.mxu1 %v2987_v2  ;;  %731 = vmatprep.mubr.f32.mxu1 %v3840_v1  ;;  %v613_v2 = vld [vmem:[#allocation11 + $0x58] sm:$0xff] }
 0x1b7   :  { %2990 = vmatprep.subr.bf16.mxu1 %v2989_v3  ;;  %v3021_v3 = vpack.c.bf16 %v613_v2, %v610_v63 }
 0x1b8   :  { %2969 = vmatpush3.bf16.msra.mxu0 %v2968_v15  ;;  %v3033_v15 = vpack.c.bf16 %v637_v14, %v634_v13 }
 0x1b9   :  { %2970 = vmatprep.subr.bf16.mxu0 %v3838_v0 }
 0x1ba   :  { %2992 = vmatpush1.bf16.msra.mxu1 %v2991_v11  ;;  %v631_v11 = vld [vmem:[#allocation11 + $0xe8] sm:$0xff] }
 0x1bb   :  { %2994 = vmatprep.subr.bf16.mxu1 %v2993_v12  ;;  %v3030_v12 = vpack.c.bf16 %v631_v11, %v628_v10 }
 0x1bc   :  { %2972 = vmatpush3.bf16.msra.mxu0 %v2971_v24 }
 0x1bd   :  { %2973 = vmatprep.subr.bf16.mxu0 %v3838_v0 }
 0x1be   :  { %2996 = vmatpush1.bf16.msra.mxu1 %v2995_v20  ;;  %v647_v20 = vld [vmem:[#allocation11 + $0x168] sm:$0xff] }
 0x1bf   :  { %2998 = vmatprep.subr.bf16.mxu1 %v2997_v21  ;;  %v646_v21 = vld [vmem:[#allocation11 + $0x160] sm:$0xff]  ;;  %v3015_v22 = vpack.c.bf16 %v647_v20, %v644_v19 }
 0x1c0   :  { %2975 = vmatpush3.bf16.msra.mxu0 %v2974_v33  ;;  %v3039_v24 = vpack.c.bf16 %v649_v23, %v646_v21  ;;  %v2176_v33 = vld [vmem:[#allocation10] ss:$0 sm:$0xff] }
 0x1c1   :  { %2976 = vmatprep.subr.bf16.mxu0 %v3838_v0 }
 0x1c2   :  { %3000 = vmatpush1.bf16.msra.mxu1 %v2999_v29 }
 0x1c3   :  { %3002 = vmatprep.subr.bf16.mxu1 %v3001_v30 }
 0x1c4   :  { %2978 = vmatpush3.bf16.msra.mxu0 %v2977_v42 }
 0x1c5   :  { %2979 = vmatprep.subr.bf16.mxu0 %v3838_v0 }
 0x1c6   :  { %3004 = vmatpush1.bf16.msra.mxu1 %v3003_v38  ;;  %v4337_v38 = vshrl.u32 %v652_v37, 7 }
 0x1c7   :  { %3006 = vmatprep.subr.bf16.mxu1 %v3005_v39 }
 0x1c8   :  { %2981 = vmatpush3.bf16.msra.mxu0 %v2980_v51  ;;  %v662_v39 = vsub.s32 2, %v4337_v38  ;;  %v658_v41 = vsub.s32 1, %v4337_v38 }
 0x1c9   :  { %2982 = vmatprep.subr.bf16.mxu0 %v3838_v0 }
 0x1ca   :  { %3008 = vmatpush1.bf16.msra.mxu1 %v3007_v47  ;;  %v663_v44 = vrot.slane %v650_v40, %v662_v39  ;;  %v659_v47 = vrot.slane %v650_v40, %v658_v41 }
 0x1cb   :  { %3010 = vmatprep.subr.bf16.mxu1 %v3009_v48 }
 0x1cc   :  { %2984 = vmatpush3.bf16.msra.mxu0 %v2983_v58  ;;  %v654_v58 = vsub.s32 0, %v4337_v38 }
 0x1cd   :  { %3017 = vmatprep.subr.bf16.mxu0 %v3838_v0 }
 0x1ce   :  { %3012 = vmatpush1.bf16.msra.mxu1 %v3011_v56 }
 0x1cf   :  { %3014 = vmatprep.subr.bf16.mxu1 %v3013_v57  ;;  %2524 = vmatmul.mubr.f32.vlgmr.msra.gmra.mrb[2].mxu0 %v507_v61  ;;  %v655_v61 = vrot.slane %v650_v40, %v654_v58  ;;  %v1046_v40 = vld [vmem:[#allocation14 + $0x8] sm:$0xff] }
 0x1d0   :  { %3019 = vmatpush3.bf16.msra.mxu0 %v3018_v62  ;;  %2558 = vmatprep.mubr.msk.f32.mxu0 %vm3839_vm0, %v3840_v1 }
 0x1d1   :  { %3020 = vmatprep.subr.bf16.mxu0 %v3838_v0 }
 0x1d2   :  { %3016 = vmatpush1.bf16.msra.mxu1 %v3015_v22 }
 0x1d3   :  { %3044 = vmatprep.subr.bf16.mxu1 %v3838_v0 }
 0x1d4   :  { %3022 = vmatpush3.bf16.msra.mxu0 %v3021_v3 }
 0x1d5   :  { %3023 = vmatprep.subr.bf16.mxu0 %v3838_v0 }
 0x1d8   :  { %3025 = vmatpush3.bf16.msra.mxu0 %v3024_v6 }
 0x1d9   :  { %3026 = vmatprep.subr.bf16.mxu0 %v3838_v0 }
 0x1dc   :  { %3028 = vmatpush3.bf16.msra.mxu0 %v3027_v9 }
 0x1dd   :  { %3029 = vmatprep.subr.bf16.mxu0 %v3838_v0 }
 0x1e0   :  { %3031 = vmatpush3.bf16.msra.mxu0 %v3030_v12 }
 0x1e1   :  { %3032 = vmatprep.subr.bf16.mxu0 %v3838_v0 }
 0x1e4   :  { %3034 = vmatpush3.bf16.msra.mxu0 %v3033_v15 }
 0x1e5   :  { %3035 = vmatprep.subr.bf16.mxu0 %v3838_v0 }
 0x1e8   :  { %3037 = vmatpush3.bf16.msra.mxu0 %v3036_v18 }
 0x1e9   :  { %3038 = vmatprep.subr.bf16.mxu0 %v3838_v0 }
 0x1ec   :  { %3040 = vmatpush3.bf16.msra.mxu0 %v3039_v24 }
 0x1ed   :  { %3041 = vmatprep.subr.bf16.mxu0 %v3838_v0 }
 0x282   :  { %v409_v26 = vpop.f32.mrb[0].mxu0 }
 0x283   :  { %v410_v28 = vadd.f32 %v2174_v25, %v409_v26  ;;  %v2455_v29 = vpop.f32.mrb[1].mxu0 }
 0x285   :  { %732 = vmatmul.mubr.f32.vlgmr.msra.gmra.mrb[2].mxu1 %v410_v28  ;;  %2559 = vmatmul.mubr.f32.vlgmr.msra.gmra.mrb[4].mxu0 %v410_v28 }
 0x286   :  { %737 = vmatprep.mubr.f32.mxu1 %v3840_v1  ;;  %2561 = vmatprep.mubr.msk.f32.mxu0 %vm3839_vm0, %v3840_v1 }
 0x288   :  { %v503_v30 = vpop.f32.mrb[0].mxu1 }
 0x289   :  { %v2490_v31 = vpop.f32.mrb[1].mxu1  ;;  %v504_v32 = vadd.f32 %v2175_v27, %v503_v30 }
 0x28b   :  { %738 = vmatmul.mubr.f32.gmra.mrb[4].mxu1 %v504_v32  ;;  %2562 = vmatmul.mubr.f32.gmra.mrb[6].mxu0 %v504_v32 }
 0x28c   :  { %743 = vmatprep.mubr.f32.mxu1 %v3840_v1  ;;  %2564 = vmatprep.mubr.msk.f32.mxu0 %vm3839_vm0, %v3840_v1 }
 0x2a2   :  { %v597_v34 = vpop.f32.mrb[2].mxu0 }
 0x2a3   :  { %v598_v35 = vadd.f32 %v2176_v33, %v597_v34  ;;  %v2525_v36 = vpop.f32.mrb[3].mxu0 }
 0x2a5   :  { %744 = vmatmul.mubr.f32.gmra.mrb[6].mxu1 %v598_v35  ;;  %2565 = vmatmul.mubr.f32.gmra.mrb[8].mxu0 %v598_v35 }
 0x2a6   :  { %2573 = vmatprep.mubr.msk.f32.mxu0 %vm3839_vm0, %v3840_v1  ;;  %2588 = vmatprep.mubr.msk.f32.mxu1 %vm3839_vm0, %v3840_v1 }
 0x358   :  { %v733_v42 = vpop.f32.mrb[2].mxu1  ;;  %v816_v43 = vpop.f32.mrb[4].mxu0 }
 0x359   :  { %v735_v45 = vpop.f32.mrb[3].mxu1  ;;  %v2560_v46 = vpop.f32.mrb[5].mxu0  ;;  %v817_v50 = vadd.f32 %v816_v43, %v663_v44  ;;  %v734_v4 = vadd.f32 %v733_v42, %v655_v61  ;;  %v1049_v42 = vld [vmem:[#allocation14 + $0x20] sm:$0xff] }
 0x35a   :  { %v736_v54 = vadd.f32 %v735_v45, %v659_v47  ;;  %v1045_v43 = vld [vmem:[#allocation14] sm:$0xff]  ;;  %v1048_v45 = vld [vmem:[#allocation14 + $0x18] sm:$0xff]  ;;  %v1047_v46 = vld [vmem:[#allocation14 + $0x10] sm:$0xff] }
 0x35e   :  { %v739_v48 = vpop.f32.mrb[4].mxu1  ;;  %v821_v49 = vpop.f32.mrb[6].mxu0 }
 0x35f   :  { %v822_v51 = vadd.f32 %v821_v49, %v663_v44  ;;  %v741_v52 = vpop.f32.mrb[5].mxu1  ;;  %v2563_v53 = vpop.f32.mrb[7].mxu0  ;;  %v740_v5 = vadd.f32 %v739_v48, %v655_v61  ;;  %v3049_v48 = vpack.c.bf16 %v1048_v45, %v1045_v43  ;;  %v1083_v43 = vld [vmem:[#allocation14 + $0x130] sm:$0xff]  ;;  %v1088_v45 = vld [vmem:[#allocation14 + $0x158] sm:$0xff] }
 0x360   :  { %v742_v55 = vadd.f32 %v741_v52, %v659_v47  ;;  %v1051_v52 = vld [vmem:[#allocation14 + $0x30] sm:$0xff] }
 0x361   :  { %v3045_v56 = vpack.c.bf16 %v822_v51, %v817_v50  ;;  %v1052_v50 = vld [vmem:[#allocation14 + $0x38] sm:$0xff]  ;;  %v1055_v51 = vld [vmem:[#allocation14 + $0x50] sm:$0xff] }
 0x362   :  { %v3042_v57 = vpack.c.bf16 %v742_v55, %v736_v54  ;;  %v3051_v53 = vpack.c.bf16 %v1055_v51, %v1052_v50  ;;  %v1054_v54 = vld [vmem:[#allocation14 + $0x48] sm:$0xff]  ;;  %v1053_v55 = vld [vmem:[#allocation14 + $0x40] sm:$0xff]  ;;  %v1087_v50 = vld [vmem:[#allocation14 + $0x150] sm:$0xff] }
 0x363   :  { %3046 = vmatpush3.bf16.msra.mxu1 %v3045_v56  ;;  %v1056_v56 = vld [vmem:[#allocation14 + $0x58] sm:$0xff]  ;;  %v1090_v51 = vld [vmem:[#allocation14 + $0x168] sm:$0xff] }
 0x364   :  { %3043 = vmatpush3.bf16.xpose.msra.mxu0 %v3042_v57  ;;  %2586 = vmatprep.subr.mxu1 %v3840_v1  ;;  %v3053_v57 = vpack.c.bf16 %v1054_v54, %v1051_v52  ;;  %v1089_v52 = vld [vmem:[#allocation14 + $0x160] sm:$0xff]  ;;  %v1092_v54 = vld [vmem:[#allocation14 + $0x178] sm:$0xff] }
 0x365   :  { %2571 = vmatprep.subr.mxu0 %v3840_v1 }
 0x378   :  { %v745_v59 = vpop.f32.mrb[6].mxu1  ;;  %v826_v60 = vpop.f32.mrb[8].mxu0 }
 0x379   :  { %v827_v62 = vadd.f32 %v826_v60, %v663_v44  ;;  %v747_v63 = vpop.f32.mrb[7].mxu1  ;;  %v2566_v2 = vpop.f32.mrb[9].mxu0  ;;  %v746_v6 = vadd.f32 %v745_v59, %v655_v61  ;;  %v3047_v44 = vpack.c.bf16 %v1049_v42, %v1046_v40  ;;  %v3083_v59 = vpack.c.bf16 %v1056_v56, %v1053_v55  ;;  %v1058_v60 = vld [vmem:[#allocation14 + $0x68] sm:$0xff]  ;;  %v1061_v61 = vld [vmem:[#allocation14 + $0x80] sm:$0xff]  ;;  %v1084_v42 = vld [vmem:[#allocation14 + $0x138] sm:$0xff] }
 0x37a   :  { %v748_v3 = vadd.f32 %v747_v63, %v659_v47  ;;  %v1050_v47 = vld [vmem:[#allocation14 + $0x28] sm:$0xff]  ;;  %v3055_v63 = vpack.c.bf16 %v1061_v61, %v1058_v60  ;;  %v1060_v2 = vld [vmem:[#allocation14 + $0x78] sm:$0xff]  ;;  %v3101_v55 = vpack.c.bf16 %v1092_v54, %v1089_v52 }
 0x37b   :  { %2587 = vmatpush3.msra.mxu1 %v827_v62  ;;  %v3080_v49 = vpack.c.bf16 %v1050_v47, %v1047_v46  ;;  %v1057_v62 = vld [vmem:[#allocation14 + $0x60] sm:$0xff]  ;;  %v1091_v46 = vld [vmem:[#allocation14 + $0x170] sm:$0xff] }
 0x37c   :  { %2572 = vmatpush3.xpose.msra.mxu0 %v748_v3  ;;  %3048 = vmatprep.subr.bf16.mxu1 %v3047_v44  ;;  %v1059_v3 = vld [vmem:[#allocation14 + $0x70] sm:$0xff]  ;;  %v1086_v44 = vld [vmem:[#allocation14 + $0x148] sm:$0xff] }
 0x37d   :  { %3079 = vmatprep.subr.bf16.mxu0 %v3838_v0 }
 0x37f   :  { %2574 = vmatmul.mubr.f32.vlgmr.msra.gmra.mrb[10].mxu0 %v734_v4  ;;  %v1062_v4 = vld [vmem:[#allocation14 + $0x88] sm:$0xff] }
 0x380   :  { %2576 = vmatprep.mubr.msk.f32.mxu0 %vm3839_vm0, %v3840_v1  ;;  %3081 = vmatpush3.bf16.msra.mxu0 %v3080_v49  ;;  %v3075_v49 = vpack.c.bf16 %v1091_v46, %v1088_v45 }
 0x381   :  { %3082 = vmatprep.subr.bf16.mxu0 %v3838_v0 }
 0x383   :  { %2577 = vmatmul.mubr.f32.gmra.mrb[12].mxu0 %v740_v5  ;;  %v1064_v5 = vld [vmem:[#allocation14 + $0x98] sm:$0xff] }
 0x384   :  { %2579 = vmatprep.mubr.msk.f32.mxu0 %vm3839_vm0, %v3840_v1  ;;  %3084 = vmatpush3.bf16.msra.mxu0 %v3083_v59 }
 0x385   :  { %3085 = vmatprep.subr.bf16.mxu0 %v3838_v0 }
 0x387   :  { %2580 = vmatmul.mubr.f32.gmra.mrb[14].mxu0 %v746_v6  ;;  %v1067_v6 = vld [vmem:[#allocation14 + $0xb0] sm:$0xff] }
 0x388   :  { %2629 = vmatprep.mubr.msk.f32.mxu0 %vm3839_vm0, %v3840_v1 }
 0x452   :  { %v896_v7 = vpop.f32.mrb[10].mxu0 }
 0x453   :  { %v910_v9 = vmul.f32 0.17677669, %v896_v7  ;;  %v2575_v10 = vpop.f32.mrb[11].mxu0  ;;  %v3057_v7 = vpack.c.bf16 %v1060_v2, %v1057_v62 }
 0x454   :  { %v1063_v10 = vld [vmem:[#allocation14 + $0x90] sm:$0xff] }
 0x455   :  { %v919_v11 = vadd.f32 %v4360_v8, %v910_v9  ;;  %v3086_v9 = vpack.c.bf16 %v1062_v4, %v1059_v3 }
 0x456   :  { %v901_v12 = vpop.f32.mrb[12].mxu0 }
 0x457   :  { %v911_v13 = vmul.f32 0.17677669, %v901_v12  ;;  %v2578_v14 = vpop.f32.mrb[13].mxu0  ;;  %v923_v15 = vsel %vm922_vm1, %v919_v11, -inf  ;;  %v1066_v12 = vld [vmem:[#allocation14 + $0xa8] sm:$0xff]  ;;  %3087 = vmatpush3.bf16.msra.mxu0 %v3086_v9 }
 0x458   :  { %924 = vmax.xlane.f32.xlu0 %v923_v15  ;;  %v1068_v14 = vld [vmem:[#allocation14 + $0xb8] sm:$0xff]  ;;  %v1070_v15 = vld [vmem:[#allocation14 + $0xc8] sm:$0xff]  ;;  %3088 = vmatprep.subr.bf16.mxu0 %v3838_v0 }
 0x459   :  { %v920_v16 = vadd.f32 %v4360_v8, %v911_v13  ;;  %v1065_v13 = vld [vmem:[#allocation14 + $0xa0] sm:$0xff] }
 0x45a   :  { %v906_v17 = vpop.f32.mrb[14].mxu0 }
 0x45b   :  { %v912_v18 = vmul.f32 0.17677669, %v906_v17  ;;  %v2581_v19 = vpop.f32.mrb[15].mxu0  ;;  %v926_v20 = vsel %vm922_vm1, %v920_v16, -inf  ;;  %v3061_v17 = vpack.c.bf16 %v1066_v12, %v1063_v10 }
 0x45c   :  { %927 = vmax.xlane.f32.xlu0 %v926_v20  ;;  %v1069_v19 = vld [vmem:[#allocation14 + $0xc0] sm:$0xff] }
 0x45d   :  { %v921_v21 = vadd.f32 %v4360_v8, %v912_v18  ;;  %v3089_v18 = vpack.c.bf16 %v1068_v14, %v1065_v13 }
 0x45f   :  { %v929_v22 = vsel %vm922_vm1, %v921_v21, -inf  ;;  %3090 = vmatpush3.bf16.msra.mxu0 %v3089_v18 }
 0x460   :  { %930 = vmax.xlane.f32.xlu1 %v929_v22  ;;  %v1071_v22 = vld [vmem:[#allocation14 + $0xd0] sm:$0xff]  ;;  %3091 = vmatprep.subr.bf16.mxu0 %v3838_v0 }
 0x4e5   :  { %v925_v23 = vpop.xlane.xlu0 %924 }
 0x4e6   :  { %v932_v24 = vsub.f32 %v919_v11, %v925_v23  ;;  %v3059_v11 = vpack.c.bf16 %v1067_v6, %v1064_v5  ;;  %v1074_v23 = vld [vmem:[#allocation14 + $0xe8] sm:$0xff] }
 0x4e8   :  { %v935_v25 = vmul.f32 1.442695, %v932_v24  ;;  %v1076_v24 = vld [vmem:[#allocation14 + $0xf8] sm:$0xff] }
 0x4e9   :  { %v928_v26 = vpop.xlane.xlu0 %927 }
 0x4ea   :  { %3305 = vpow2.f32 %v935_v25  ;;  %v933_v27 = vsub.f32 %v920_v16, %v928_v26  ;;  %v1073_v16 = vld [vmem:[#allocation14 + $0xe0] sm:$0xff]  ;;  %v1079_v25 = vld [vmem:[#allocation14 + $0x110] sm:$0xff] }
 0x4eb   :  { %v3063_v20 = vpack.c.bf16 %v1073_v16, %v1070_v15 }
 0x4ec   :  { %v937_v28 = vmul.f32 1.442695, %v933_v27  ;;  %v3092_v27 = vpack.c.bf16 %v1074_v23, %v1071_v22 }
 0x4ed   :  { %v931_v29 = vpop.xlane.xlu1 %930 }
 0x4ee   :  { %3307 = vpow2.f32 %v937_v28  ;;  %v934_v30 = vsub.f32 %v921_v21, %v931_v29  ;;  %v1072_v21 = vld [vmem:[#allocation14 + $0xd8] sm:$0xff]  ;;  %v1075_v28 = vld [vmem:[#allocation14 + $0xf0] sm:$0xff]  ;;  %v3067_v29 = vpack.c.bf16 %v1079_v25, %v1076_v24  ;;  %3093 = vmatpush3.bf16.msra.mxu0 %v3092_v27 }
 0x4ef   :  { %v3065_v26 = vpack.c.bf16 %v1072_v21, %v1069_v19  ;;  %3094 = vmatprep.subr.bf16.mxu0 %v3838_v0 }
 0x4f0   :  { %v939_v31 = vmul.f32 1.442695, %v934_v30  ;;  %v1078_v30 = vld [vmem:[#allocation14 + $0x108] sm:$0xff] }
 0x4f2   :  { %3309 = vpow2.f32 %v939_v31  ;;  %v1077_v31 = vld [vmem:[#allocation14 + $0x100] sm:$0xff] }
 0x4f4   :  { %v3306_v32 = vpop.eup %3305 }
 0x4f5   :  { %2589 = vmatmul.mubr.msk.f32.vlgmr.msra.gmra.mrb[8].mxu1 %vm922_vm1, %v3306_v32  ;;  %v941_v33 = vsel %vm922_vm1, %v3306_v32, 0.0  ;;  %v1080_v32 = vld [vmem:[#allocation14 + $0x118] sm:$0xff] }
 0x4f6   :  { %942 = vadd.xlane.f32.xlu1 %v941_v33  ;;  %2591 = vmatprep.mubr.msk.f32.mxu1 %vm3839_vm0, %v3840_v1  ;;  %v1082_v33 = vld [vmem:[#allocation14 + $0x128] sm:$0xff] }
 0x4f7   :  { %3050 = vmatpush1.bf16.msra.mxu1 %v3049_v48  ;;  %v3098_v48 = vpack.c.bf16 %v1086_v44, %v1083_v43 }
 0x4f8   :  { %v3308_v34 = vpop.eup %3307  ;;  %3052 = vmatprep.subr.bf16.mxu1 %v3051_v53  ;;  %v3077_v53 = vpack.c.bf16 %v1090_v51, %v1087_v50 }
 0x4f9   :  { %2592 = vmatmul.mubr.msk.f32.gmra.mrb[10].mxu1 %vm922_vm1, %v3308_v34  ;;  %v944_v35 = vsel %vm922_vm1, %v3308_v34, 0.0  ;;  %v1085_v34 = vld [vmem:[#allocation14 + $0x140] sm:$0xff] }
 0x4fa   :  { %945 = vadd.xlane.f32.xlu0 %v944_v35  ;;  %2594 = vmatprep.mubr.msk.f32.mxu1 %vm3839_vm0, %v3840_v1  ;;  %v3069_v35 = vpack.c.bf16 %v1078_v30, %v1075_v28  ;;  %v3071_v40 = vpack.c.bf16 %v1085_v34, %v1082_v33 }
 0x4fb   :  { %3054 = vmatpush1.bf16.msra.mxu1 %v3053_v57 }
 0x4fc   :  { %v3310_v36 = vpop.eup %3309  ;;  %3056 = vmatprep.subr.bf16.mxu1 %v3055_v63 }
 0x4fd   :  { %2595 = vmatmul.mubr.msk.f32.gmra.mrb[12].mxu1 %vm922_vm1, %v3310_v36  ;;  %v947_v37 = vsel %vm922_vm1, %v3310_v36, 0.0  ;;  %v3095_v36 = vpack.c.bf16 %v1080_v32, %v1077_v31 }
 0x4fe   :  { %948 = vadd.xlane.f32.xlu1 %v947_v37  ;;  %1174 = vmatprep.mubr.f32.mxu1 %v3840_v1  ;;  %v1081_v37 = vld [vmem:[#allocation14 + $0x120] sm:$0xff] }
 0x4ff   :  { %3058 = vmatpush1.bf16.msra.mxu1 %v3057_v7  ;;  %3096 = vmatpush3.bf16.msra.mxu0 %v3095_v36  ;;  %v3073_v47 = vpack.c.bf16 %v1084_v42, %v1081_v37 }
 0x500   :  { %3060 = vmatprep.subr.bf16.mxu1 %v3059_v11  ;;  %3097 = vmatprep.subr.bf16.mxu0 %v3838_v0  ;;  %v1093_v11 = vld [vmem:[#allocation16] sm:$0x7] }
 0x501   :  { %v1106_v14 = vrot.slane %v1093_v11, %v662_v39 }
 0x503   :  { %3062 = vmatpush1.bf16.msra.mxu1 %v3061_v17  ;;  %3099 = vmatpush3.bf16.msra.mxu0 %v3098_v48  ;;  %v1102_v17 = vrot.slane %v1093_v11, %v658_v41  ;;  %v1098_v41 = vrot.slane %v1093_v11, %v654_v58  ;;  %v1486_v11 = vld [vmem:[#allocation17 + $0x10] sm:$0xff] }
 0x504   :  { %3064 = vmatprep.subr.bf16.mxu1 %v3063_v20  ;;  %3100 = vmatprep.subr.bf16.mxu0 %v3838_v0 }
 0x507   :  { %3066 = vmatpush1.bf16.msra.mxu1 %v3065_v26  ;;  %3102 = vmatpush3.bf16.msra.mxu0 %v3101_v55 }
 0x508   :  { %3068 = vmatprep.subr.bf16.mxu1 %v3067_v29  ;;  %3106 = vmatprep.subr.bf16.mxu0 %v3838_v0 }
 0x50b   :  { %3070 = vmatpush1.bf16.msra.mxu1 %v3069_v35 }
 0x50c   :  { %3072 = vmatprep.subr.bf16.mxu1 %v3071_v40 }
 0x50f   :  { %3074 = vmatpush1.bf16.msra.mxu1 %v3073_v47 }
 0x510   :  { %3076 = vmatprep.subr.bf16.mxu1 %v3075_v49 }
 0x513   :  { %3078 = vmatpush1.bf16.msra.mxu1 %v3077_v53 }
 0x514   :  { %3103 = vmatprep.subr.bf16.mxu1 %v3838_v0 }
 0x583   :  { %v943_v56 = vpop.xlane.xlu1 %942 }
 0x584   :  { %3311 = vrcp.f32 %v943_v56 }
 0x587   :  { %v946_v57 = vpop.xlane.xlu0 %945 }
 0x588   :  { %3313 = vrcp.f32 %v946_v57 }
 0x58b   :  { %v949_v59 = vpop.xlane.xlu1 %948 }
 0x58c   :  { %3315 = vrcp.f32 %v949_v59 }
 0x58e   :  { %v3312_v60 = vpop.eup %3311 }
 0x592   :  { %v3314_v2 = vpop.eup %3313 }
 0x596   :  { %v3316_v6 = vpop.eup %3315 }
 0x5c8   :  { %v1025_v61 = vpop.f32.mrb[8].mxu1 }
 0x5c9   :  { %v1040_v62 = vmul.f32 %v3312_v60, %v1025_v61  ;;  %v2590_v63 = vpop.f32.mrb[9].mxu1 }
 0x5cb   :  { %1175 = vmatmul.mubr.f32.vlgmr.msra.gmra.mrb[14].mxu1 %v1040_v62  ;;  %2630 = vmatmul.mubr.f32.vlgmr.msra.gmra.mrb[16].mxu0 %v1040_v62 }
 0x5cc   :  { %v1030_v3 = vpop.f32.mrb[10].mxu1  ;;  %1180 = vmatprep.mubr.f32.mxu1 %v3840_v1  ;;  %2632 = vmatprep.mubr.msk.f32.mxu0 %vm3839_vm0, %v3840_v1 }
 0x5cd   :  { %v1042_v4 = vmul.f32 %v3314_v2, %v1030_v3  ;;  %v2593_v5 = vpop.f32.mrb[11].mxu1 }
 0x5ce   :  { %v1484_v5 = vld [vmem:[#allocation17] sm:$0xff] }
 0x5cf   :  { %1181 = vmatmul.mubr.f32.gmra.mrb[16].mxu1 %v1042_v4  ;;  %2633 = vmatmul.mubr.f32.gmra.mrb[18].mxu0 %v1042_v4 }
 0x5d0   :  { %v1035_v7 = vpop.f32.mrb[12].mxu1  ;;  %1186 = vmatprep.mubr.f32.mxu1 %v3840_v1  ;;  %2635 = vmatprep.mubr.msk.f32.mxu0 %vm3839_vm0, %v3840_v1 }
 0x5d1   :  { %v1044_v9 = vmul.f32 %v3316_v6, %v1035_v7  ;;  %v2596_v10 = vpop.f32.mrb[13].mxu1  ;;  %v1485_v6 = vld [vmem:[#allocation17 + $0x8] sm:$0xff]  ;;  %v1501_v7 = vld [vmem:[#allocation17 + $0x80] sm:$0xff] }
 0x5d2   :  { %v1502_v10 = vld [vmem:[#allocation17 + $0x88] sm:$0xff] }
 0x5d3   :  { %1187 = vmatmul.mubr.f32.gmra.mrb[18].mxu1 %v1044_v9  ;;  %2636 = vmatmul.mubr.f32.gmra.mrb[20].mxu0 %v1044_v9  ;;  %v3134_v9 = vpack.c.bf16 %v1485_v6, %v1484_v5  ;;  %v1660_v5 = vld [vmem:[#allocation17 + $0x110] sm:$0xff]  ;;  %v1661_v6 = vld [vmem:[#allocation17 + $0x118] sm:$0xff] }
 0x5d4   :  { %2644 = vmatprep.mubr.msk.f32.mxu1 %vm3839_vm0, %v3840_v1  ;;  %2659 = vmatprep.mubr.msk.f32.mxu0 %vm3839_vm0, %v3840_v1 }
 0x69e   :  { %v1176_v12 = vpop.f32.mrb[14].mxu1  ;;  %v1259_v13 = vpop.f32.mrb[16].mxu0 }
 0x69f   :  { %v1178_v15 = vpop.f32.mrb[15].mxu1  ;;  %v2631_v16 = vpop.f32.mrb[17].mxu0  ;;  %v1260_v20 = vadd.f32 %v1259_v13, %v1106_v14  ;;  %v1177_v33 = vadd.f32 %v1176_v12, %v1098_v41  ;;  %v1487_v12 = vld [vmem:[#allocation17 + $0x18] sm:$0xff]  ;;  %v3110_v13 = vpack.c.bf16 %v1502_v10, %v1501_v7  ;;  %v3161_v10 = vpack.c.bf16 %v1661_v6, %v1660_v5  ;;  %v1857_v5 = vld [vmem:[#allocation23 + $0x48] sm:$0xff] }
 0x6a0   :  { %v1179_v24 = vadd.f32 %v1178_v15, %v1102_v17  ;;  %v1504_v15 = vld [vmem:[#allocation17 + $0x98] sm:$0xff]  ;;  %v3137_v16 = vpack.c.bf16 %v1487_v12, %v1486_v11 }
 0x6a2   :  { %v1182_v18 = vpop.f32.mrb[16].mxu1  ;;  %v1264_v19 = vpop.f32.mrb[18].mxu0 }
 0x6a3   :  { %v1265_v21 = vadd.f32 %v1264_v19, %v1106_v14  ;;  %v1184_v22 = vpop.f32.mrb[17].mxu1  ;;  %v2634_v23 = vpop.f32.mrb[19].mxu0  ;;  %v1183_v34 = vadd.f32 %v1182_v18, %v1098_v41  ;;  %v1488_v18 = vld [vmem:[#allocation17 + $0x20] sm:$0xff]  ;;  %v1489_v19 = vld [vmem:[#allocation17 + $0x28] sm:$0xff] }
 0x6a4   :  { %v1185_v25 = vadd.f32 %v1184_v22, %v1102_v17  ;;  %v3140_v22 = vpack.c.bf16 %v1489_v19, %v1488_v18  ;;  %v1666_v19 = vld [vmem:[#allocation17 + $0x140] sm:$0xff] }
 0x6a5   :  { %v3107_v26 = vpack.c.bf16 %v1265_v21, %v1260_v20  ;;  %v1505_v20 = vld [vmem:[#allocation17 + $0xa0] sm:$0xff]  ;;  %v1506_v21 = vld [vmem:[#allocation17 + $0xa8] sm:$0xff] }
 0x6a6   :  { %v3104_v27 = vpack.c.bf16 %v1185_v25, %v1179_v24  ;;  %v1188_v28 = vpop.f32.mrb[18].mxu1  ;;  %v1269_v29 = vpop.f32.mrb[20].mxu0  ;;  %v3116_v23 = vpack.c.bf16 %v1506_v21, %v1505_v20  ;;  %v1490_v24 = vld [vmem:[#allocation17 + $0x30] sm:$0xff]  ;;  %v1491_v25 = vld [vmem:[#allocation17 + $0x38] sm:$0xff]  ;;  %v1667_v20 = vld [vmem:[#allocation17 + $0x148] sm:$0xff] }
 0x6a7   :  { %v1190_v30 = vpop.f32.mrb[19].mxu1  ;;  %v2637_v31 = vpop.f32.mrb[21].mxu0  ;;  %3108 = vmatpush3.bf16.msra.mxu0 %v3107_v26  ;;  %v1270_v39 = vadd.f32 %v1269_v29, %v1106_v14  ;;  %v1189_v35 = vadd.f32 %v1188_v28, %v1098_v41  ;;  %v1503_v14 = vld [vmem:[#allocation17 + $0x90] sm:$0xff]  ;;  %v3143_v28 = vpack.c.bf16 %v1491_v25, %v1490_v24  ;;  %v1510_v41 = vld [vmem:[#allocation17 + $0xc8] sm:$0xff]  ;;  %v3170_v21 = vpack.c.bf16 %v1667_v20, %v1666_v19  ;;  %v1670_v25 = vld [vmem:[#allocation17 + $0x160] sm:$0xff] }
 0x6a8   :  { %3105 = vmatpush3.bf16.xpose.msra.mxu1 %v3104_v27  ;;  %2657 = vmatprep.subr.mxu0 %v3840_v1  ;;  %v1191_v32 = vadd.f32 %v1190_v30, %v1102_v17  ;;  %v3113_v17 = vpack.c.bf16 %v1504_v15, %v1503_v14  ;;  %v1507_v26 = vld [vmem:[#allocation17 + $0xb0] sm:$0xff]  ;;  %v1508_v27 = vld [vmem:[#allocation17 + $0xb8] sm:$0xff]  ;;  %v1492_v30 = vld [vmem:[#allocation17 + $0x40] sm:$0xff] }
 0x6a9   :  { %2642 = vmatprep.subr.mxu1 %v3840_v1  ;;  %v3119_v29 = vpack.c.bf16 %v1508_v27, %v1507_v26  ;;  %v1493_v31 = vld [vmem:[#allocation17 + $0x48] sm:$0xff]  ;;  %v2184_v20 = vld [vmem:[#allocation19] ss:$0 sm:$0xff] }
 0x6aa   :  { %v1663_v14 = vld [vmem:[#allocation17 + $0x128] sm:$0xff] }
 0x6ab   :  { %2658 = vmatpush3.msra.mxu0 %v1270_v39  ;;  %v1509_v39 = vld [vmem:[#allocation17 + $0xc0] sm:$0xff]  ;;  %v1671_v26 = vld [vmem:[#allocation17 + $0x168] sm:$0xff] }
 0x6ac   :  { %3133 = vmatprep.subr.bf16.mxu0 %v3838_v0  ;;  %v3176_v27 = vpack.c.bf16 %v1671_v26, %v1670_v25 }
 0x6b0   :  { %2643 = vmatpush3.xpose.msra.mxu1 %v1191_v32  ;;  %v3146_v32 = vpack.c.bf16 %v1493_v31, %v1492_v30  ;;  %v1754_v31 = vld [vmem:[#allocation20] sm:$0xff] }
 0x6b1   :  { %3109 = vmatprep.subr.bf16.mxu1 %v3838_v0 }
 0x6b3   :  { %2645 = vmatmul.mubr.f32.vlgmr.msra.gmra.mrb[20].mxu1 %v1177_v33  ;;  %v3122_v33 = vpack.c.bf16 %v1510_v41, %v1509_v39  ;;  %v1755_v39 = vld [vmem:[#allocation20 + $0x8] sm:$0xff]  ;;  %v1756_v41 = vld [vmem:[#allocation20 + $0x10] sm:$0xff] }
 0x6b4   :  { %2647 = vmatprep.mubr.msk.f32.mxu1 %vm3839_vm0, %v3840_v1  ;;  %3111 = vmatpush3.bf16.msra.mxu1 %v3110_v13  ;;  %v1662_v13 = vld [vmem:[#allocation17 + $0x120] sm:$0xff] }
 0x6b5   :  { %3112 = vmatprep.subr.bf16.mxu1 %v3838_v0  ;;  %v3164_v15 = vpack.c.bf16 %v1663_v14, %v1662_v13 }
 0x6b7   :  { %2648 = vmatmul.mubr.f32.gmra.mrb[22].mxu1 %v1183_v34  ;;  %v1494_v34 = vld [vmem:[#allocation17 + $0x50] sm:$0xff] }
 0x6b8   :  { %2650 = vmatprep.mubr.msk.f32.mxu1 %vm3839_vm0, %v3840_v1  ;;  %3114 = vmatpush3.bf16.msra.mxu1 %v3113_v17  ;;  %v1665_v17 = vld [vmem:[#allocation17 + $0x138] sm:$0xff] }
 0x6b9   :  { %3115 = vmatprep.subr.bf16.mxu1 %v3838_v0 }
 0x6bb   :  { %2651 = vmatmul.mubr.f32.gmra.mrb[24].mxu1 %v1189_v35  ;;  %v1495_v35 = vld [vmem:[#allocation17 + $0x58] sm:$0xff] }
 0x6bc   :  { %2700 = vmatprep.mubr.msk.f32.mxu1 %vm3839_vm0, %v3840_v1  ;;  %3117 = vmatpush3.bf16.msra.mxu1 %v3116_v23  ;;  %v1669_v23 = vld [vmem:[#allocation17 + $0x158] sm:$0xff] }
 0x6bd   :  { %3118 = vmatprep.subr.bf16.mxu1 %v3838_v0 }
 0x6c0   :  { %3120 = vmatpush3.bf16.msra.mxu1 %v3119_v29  ;;  %v1673_v29 = vld [vmem:[#allocation17 + $0x178] sm:$0xff] }
 0x6c1   :  { %3121 = vmatprep.subr.bf16.mxu1 %v3838_v0 }
 0x6c4   :  { %3123 = vmatpush3.bf16.msra.mxu1 %v3122_v33  ;;  %v1757_v33 = vld [vmem:[#allocation20 + $0x18] sm:$0xff] }
 0x6c5   :  { %3124 = vmatprep.subr.bf16.mxu1 %v3838_v0 }
 0x786   :  { %v1339_v38 = vpop.f32.mrb[20].mxu1 }
 0x787   :  { %v1353_v58 = vmul.f32 0.25, %v1339_v38  ;;  %v2646_v36 = vpop.f32.mrb[21].mxu1  ;;  %v1511_v38 = vld [vmem:[#allocation17 + $0xd0] sm:$0xff] }
 0x788   :  { %v3149_v36 = vpack.c.bf16 %v1495_v35, %v1494_v34  ;;  %v3185_v34 = vpack.c.bf16 %v1757_v33, %v1756_v41  ;;  %v1758_v35 = vld [vmem:[#allocation20 + $0x20] sm:$0xff] }
 0x789   :  { %v1356_v37 = vadd.f32 %v4360_v8, %v1353_v58  ;;  %v1512_v58 = vld [vmem:[#allocation17 + $0xd8] sm:$0xff] }
 0x78a   :  { %v1344_v40 = vpop.f32.mrb[22].mxu1  ;;  %v1950_v33 = vld [vmem:[#allocation26 + $0x38] sm:$0xff] }
 0x78b   :  { %v1354_v42 = vmul.f32 0.25, %v1344_v40  ;;  %v2649_v43 = vpop.f32.mrb[23].mxu1  ;;  %v1359_v44 = vsel %vm922_vm1, %v1356_v37, -inf  ;;  %v1496_v40 = vld [vmem:[#allocation17 + $0x60] sm:$0xff] }
 0x78c   :  { %1360 = vmax.xlane.f32.xlu0 %v1359_v44  ;;  %v1513_v43 = vld [vmem:[#allocation17 + $0xe0] sm:$0xff]  ;;  %v1514_v44 = vld [vmem:[#allocation17 + $0xe8] sm:$0xff] }
 0x78d   :  { %v1357_v45 = vadd.f32 %v4360_v8, %v1354_v42  ;;  %v1497_v42 = vld [vmem:[#allocation17 + $0x68] sm:$0xff] }
 0x78e   :  { %v1349_v46 = vpop.f32.mrb[24].mxu1 }
 0x78f   :  { %v1355_v47 = vmul.f32 0.25, %v1349_v46  ;;  %v2652_v48 = vpop.f32.mrb[25].mxu1  ;;  %v1362_v49 = vsel %vm922_vm1, %v1357_v45, -inf  ;;  %v3128_v46 = vpack.c.bf16 %v1514_v44, %v1513_v43  ;;  %v1763_v43 = vld [vmem:[#allocation20 + $0x48] sm:$0xff] }
 0x790   :  { %1363 = vmax.xlane.f32.xlu1 %v1362_v49  ;;  %v1499_v48 = vld [vmem:[#allocation17 + $0x78] sm:$0xff] }
 0x791   :  { %v1358_v50 = vadd.f32 %v4360_v8, %v1355_v47  ;;  %v1498_v47 = vld [vmem:[#allocation17 + $0x70] sm:$0xff] }
 0x792   :  { %v3155_v49 = vpack.c.bf16 %v1499_v48, %v1498_v47  ;;  %v1766_v48 = vld [vmem:[#allocation20 + $0x60] sm:$0xff] }
 0x793   :  { %v1365_v51 = vsel %vm922_vm1, %v1358_v50, -inf }
 0x794   :  { %1366 = vmax.xlane.f32.xlu0 %v1365_v51  ;;  %v1516_v51 = vld [vmem:[#allocation17 + $0xf8] sm:$0xff] }
 0x819   :  { %v1361_v52 = vpop.xlane.xlu0 %1360 }
 0x81a   :  { %v1368_v53 = vsub.f32 %v1356_v37, %v1361_v52  ;;  %v3125_v37 = vpack.c.bf16 %v1512_v58, %v1511_v38  ;;  %v1759_v38 = vld [vmem:[#allocation20 + $0x28] sm:$0xff] }
 0x81b   :  { %v3188_v58 = vpack.c.bf16 %v1759_v38, %v1758_v35  ;;  %v1951_v35 = vld [vmem:[#allocation26 + $0x40] sm:$0xff]  ;;  %v1952_v38 = vld [vmem:[#allocation26 + $0x48] sm:$0xff] }
 0x81c   :  { %v1371_v54 = vmul.f32 1.442695, %v1368_v53  ;;  %3126 = vmatpush3.bf16.msra.mxu1 %v3125_v37  ;;  %v1761_v37 = vld [vmem:[#allocation20 + $0x38] sm:$0xff] }
 0x81d   :  { %v1364_v55 = vpop.xlane.xlu1 %1363  ;;  %3127 = vmatprep.subr.bf16.mxu1 %v3838_v0 }
 0x81e   :  { %3317 = vpow2.f32 %v1371_v54  ;;  %v1369_v56 = vsub.f32 %v1357_v45, %v1364_v55  ;;  %v3152_v45 = vpack.c.bf16 %v1497_v42, %v1496_v40  ;;  %v1762_v42 = vld [vmem:[#allocation20 + $0x40] sm:$0xff] }
 0x81f   :  { %v3194_v44 = vpack.c.bf16 %v1763_v43, %v1762_v42  ;;  %v1955_v42 = vld [vmem:[#allocation26 + $0x60] sm:$0xff]  ;;  %v1956_v43 = vld [vmem:[#allocation26 + $0x68] sm:$0xff] }
 0x820   :  { %v1373_v57 = vmul.f32 1.442695, %v1369_v56  ;;  %3129 = vmatpush3.bf16.msra.mxu1 %v3128_v46  ;;  %v1765_v46 = vld [vmem:[#allocation20 + $0x58] sm:$0xff] }
 0x821   :  { %v1367_v59 = vpop.xlane.xlu0 %1366  ;;  %3130 = vmatprep.subr.bf16.mxu1 %v3838_v0 }
 0x822   :  { %3319 = vpow2.f32 %v1373_v57  ;;  %v1370_v60 = vsub.f32 %v1358_v50, %v1367_v59  ;;  %v1515_v50 = vld [vmem:[#allocation17 + $0xf0] sm:$0xff] }
 0x823   :  { %v3131_v52 = vpack.c.bf16 %v1516_v51, %v1515_v50  ;;  %v1768_v51 = vld [vmem:[#allocation20 + $0x70] sm:$0xff] }
 0x824   :  { %v1375_v61 = vmul.f32 1.442695, %v1370_v60 }
 0x825   :  { %3132 = vmatpush3.bf16.msra.mxu1 %v3131_v52  ;;  %v1769_v52 = vld [vmem:[#allocation20 + $0x78] sm:$0xff] }
 0x826   :  { %3321 = vpow2.f32 %v1375_v61  ;;  %3157 = vmatprep.subr.bf16.mxu1 %v3838_v0  ;;  %v1658_v61 = vld [vmem:[#allocation17 + $0x100] sm:$0xff] }
 0x828   :  { %v3318_v62 = vpop.eup %3317 }
 0x829   :  { %2660 = vmatmul.mubr.msk.f32.vlgmr.msra.gmra.mrb[22].mxu0 %vm922_vm1, %v3318_v62  ;;  %v1377_v8 = vsel %vm922_vm1, %v3318_v62, 0.0  ;;  %v1659_v62 = vld [vmem:[#allocation17 + $0x108] sm:$0xff] }
 0x82a   :  { %1378 = vadd.xlane.f32.xlu0 %v1377_v8  ;;  %2662 = vmatprep.mubr.msk.f32.mxu0 %vm3839_vm0, %v3840_v1 }
 0x82b   :  { %3135 = vmatpush3.bf16.msra.mxu0 %v3134_v9 }
 0x82c   :  { %v3320_v63 = vpop.eup %3319  ;;  %3136 = vmatprep.subr.bf16.mxu0 %v3838_v0 }
 0x82d   :  { %2663 = vmatmul.mubr.msk.f32.gmra.mrb[24].mxu0 %vm922_vm1, %v3320_v63  ;;  %v1380_v2 = vsel %vm922_vm1, %v3320_v63, 0.0 }
 0x82e   :  { %1381 = vadd.xlane.f32.xlu1 %v1380_v2  ;;  %2665 = vmatprep.mubr.msk.f32.mxu0 %vm3839_vm0, %v3840_v1  ;;  %v3158_v2 = vpack.c.bf16 %v1659_v62, %v1658_v61  ;;  %v1852_v61 = vld [vmem:[#allocation23 + $0x20] sm:$0xff]  ;;  %v1853_v62 = vld [vmem:[#allocation23 + $0x28] sm:$0xff] }
 0x82f   :  { %3138 = vmatpush3.bf16.msra.mxu0 %v3137_v16  ;;  %v1664_v16 = vld [vmem:[#allocation17 + $0x130] sm:$0xff] }
 0x830   :  { %v3322_v3 = vpop.eup %3321  ;;  %3139 = vmatprep.subr.bf16.mxu0 %v3838_v0  ;;  %v3167_v18 = vpack.c.bf16 %v1665_v17, %v1664_v16 }
 0x831   :  { %2666 = vmatmul.mubr.msk.f32.gmra.mrb[26].mxu0 %vm922_vm1, %v3322_v3  ;;  %v1383_v4 = vsel %vm922_vm1, %v3322_v3, 0.0 }
 0x832   :  { %1384 = vadd.xlane.f32.xlu1 %v1383_v4  ;;  %2735 = vmatprep.mubr.msk.f32.mxu0 %vm3839_vm0, %v3840_v1 }
 0x833   :  { %3141 = vmatpush3.bf16.msra.mxu0 %v3140_v22  ;;  %v1668_v22 = vld [vmem:[#allocation17 + $0x150] sm:$0xff] }
 0x834   :  { %3142 = vmatprep.subr.bf16.mxu0 %v3838_v0  ;;  %v3173_v24 = vpack.c.bf16 %v1669_v23, %v1668_v22  ;;  %v1943_v23 = vld [vmem:[#allocation26] sm:$0xff] }
 0x837   :  { %3144 = vmatpush3.bf16.msra.mxu0 %v3143_v28  ;;  %v1672_v28 = vld [vmem:[#allocation17 + $0x170] sm:$0xff] }
 0x838   :  { %3145 = vmatprep.subr.bf16.mxu0 %v3838_v0  ;;  %v3179_v30 = vpack.c.bf16 %v1673_v29, %v1672_v28  ;;  %v1945_v28 = vld [vmem:[#allocation26 + $0x10] sm:$0xff]  ;;  %v1946_v29 = vld [vmem:[#allocation26 + $0x18] sm:$0xff] }
 0x83b   :  { %3147 = vmatpush3.bf16.msra.mxu0 %v3146_v32  ;;  %v3182_v32 = vpack.c.bf16 %v1755_v39, %v1754_v31  ;;  %v1947_v31 = vld [vmem:[#allocation26 + $0x20] sm:$0xff]  ;;  %v1948_v39 = vld [vmem:[#allocation26 + $0x28] sm:$0xff] }
 0x83c   :  { %3148 = vmatprep.subr.bf16.mxu0 %v3838_v0  ;;  %v3236_v41 = vpack.c.bf16 %v1948_v39, %v1947_v31 }
 0x83f   :  { %3150 = vmatpush3.bf16.msra.mxu0 %v3149_v36  ;;  %v1760_v36 = vld [vmem:[#allocation20 + $0x30] sm:$0xff] }
 0x840   :  { %3151 = vmatprep.subr.bf16.mxu0 %v3838_v0  ;;  %v3191_v40 = vpack.c.bf16 %v1761_v37, %v1760_v36  ;;  %v1953_v36 = vld [vmem:[#allocation26 + $0x50] sm:$0xff]  ;;  %v1954_v37 = vld [vmem:[#allocation26 + $0x58] sm:$0xff] }
 0x843   :  { %3153 = vmatpush3.bf16.msra.mxu0 %v3152_v45  ;;  %v1764_v45 = vld [vmem:[#allocation20 + $0x50] sm:$0xff] }
 0x844   :  { %3154 = vmatprep.subr.bf16.mxu0 %v3838_v0  ;;  %v3197_v47 = vpack.c.bf16 %v1765_v46, %v1764_v45  ;;  %v1957_v45 = vld [vmem:[#allocation26 + $0x70] sm:$0xff]  ;;  %v1958_v46 = vld [vmem:[#allocation26 + $0x78] sm:$0xff] }
 0x847   :  { %3156 = vmatpush3.bf16.msra.mxu0 %v3155_v49  ;;  %v1767_v49 = vld [vmem:[#allocation20 + $0x68] sm:$0xff] }
 0x848   :  { %3181 = vmatprep.subr.bf16.mxu0 %v3838_v0  ;;  %v3200_v50 = vpack.c.bf16 %v1767_v49, %v1766_v48  ;;  %v1862_v48 = vld [vmem:[#allocation23 + $0x70] sm:$0xff]  ;;  %v1863_v49 = vld [vmem:[#allocation23 + $0x78] sm:$0xff] }
 0x8b7   :  { %v1379_v53 = vpop.xlane.xlu0 %1378 }
 0x8b8   :  { %3323 = vrcp.f32 %v1379_v53  ;;  %v3203_v53 = vpack.c.bf16 %v1769_v52, %v1768_v51  ;;  %v2185_v51 = vld [vmem:[#allocation22] ss:$0 sm:$0xff]  ;;  %v2037_v52 = vld [vmem:[#allocation29] sm:$0xff] }
 0x8bb   :  { %v1382_v54 = vpop.xlane.xlu1 %1381 }
 0x8bc   :  { %3325 = vrcp.f32 %v1382_v54  ;;  %v1848_v54 = vld [vmem:[#allocation23] sm:$0xff] }
 0x8bf   :  { %v1385_v55 = vpop.xlane.xlu1 %1384 }
 0x8c0   :  { %3327 = vrcp.f32 %v1385_v55  ;;  %v1849_v55 = vld [vmem:[#allocation23 + $0x8] sm:$0xff] }
 0x8c2   :  { %v3324_v56 = vpop.eup %3323 }
 0x8c6   :  { %v3326_v8 = vpop.eup %3325 }
 0x8ca   :  { %v3328_v7 = vpop.eup %3327 }
 0x8fc   :  { %v1461_v57 = vpop.f32.mrb[22].mxu0 }
 0x8fd   :  { %v1476_v59 = vmul.f32 %v3324_v56, %v1461_v57  ;;  %v2661_v60 = vpop.f32.mrb[23].mxu0  ;;  %v1850_v56 = vld [vmem:[#allocation23 + $0x10] sm:$0xff]  ;;  %v3206_v57 = vpack.c.bf16 %v1849_v55, %v1848_v54 }
 0x8ff   :  { %1481 = vst [vmem:[%s4553_s24] sm:$0xff] %v1476_v59  ;;  %2736 = vmatmul.mubr.f32.vlgmr.msra.gmra.mrb[28].mxu0 %v1476_v59  ;;  %v1851_v59 = vld [vmem:[#allocation23 + $0x18] sm:$0xff] }
 0x900   :  { %v1466_v63 = vpop.f32.mrb[24].mxu0  ;;  %2805 = vmatprep.mubr.msk.f32.mxu0 %vm3839_vm0, %v3840_v1  ;;  %3183 = vmatpush3.bf16.msra.mxu0 %v3182_v32  ;;  %v3209_v60 = vpack.c.bf16 %v1851_v59, %v1850_v56  ;;  %v1949_v32 = vld [vmem:[#allocation26 + $0x30] sm:$0xff] }
 0x901   :  { %v1478_v3 = vmul.f32 %v3326_v8, %v1466_v63  ;;  %v2664_v4 = vpop.f32.mrb[25].mxu0  ;;  %3184 = vmatprep.subr.bf16.mxu0 %v3838_v0  ;;  %v3212_v8 = vpack.c.bf16 %v1853_v62, %v1852_v61  ;;  %v1854_v63 = vld [vmem:[#allocation23 + $0x30] sm:$0xff]  ;;  %v2040_v61 = vld [vmem:[#allocation29 + $0x18] sm:$0xff] }
 0x902   :  { %v1856_v4 = vld [vmem:[#allocation23 + $0x40] sm:$0xff] }
 0x903   :  { %1482 = vst [vmem:[%s4553_s24 + $0x8] sm:$0xff] %v1478_v3  ;;  %2701 = vmatmul.mubr.f32.vlgmr.msra.gmra.mrb[26].mxu1 %v1478_v3  ;;  %v3218_v6 = vpack.c.bf16 %v1857_v5, %v1856_v4  ;;  %v2044_v4 = vld [vmem:[#allocation29 + $0x38] sm:$0xff] }
 0x904   :  { %3159 = vmatpush3.bf16.msra.mxu1 %v3158_v2  ;;  %v1471_v9 = vpop.f32.mrb[26].mxu0  ;;  %2770 = vmatprep.mubr.msk.f32.mxu1 %vm3839_vm0, %v3840_v1  ;;  %v1855_v2 = vld [vmem:[#allocation23 + $0x38] sm:$0xff] }
 0x905   :  { %v1480_v11 = vmul.f32 %v3328_v7, %v1471_v9  ;;  %v2667_v12 = vpop.f32.mrb[27].mxu0  ;;  %3160 = vmatprep.subr.bf16.mxu1 %v3838_v0  ;;  %3186 = vmatpush3.bf16.msra.mxu0 %v3185_v34  ;;  %v3215_v3 = vpack.c.bf16 %v1855_v2, %v1854_v63  ;;  %v1858_v7 = vld [vmem:[#allocation23 + $0x50] sm:$0xff]  ;;  %v1859_v9 = vld [vmem:[#allocation23 + $0x58] sm:$0xff]  ;;  %v3239_v34 = vpack.c.bf16 %v1950_v33, %v1949_v32 }
 0x906   :  { %3187 = vmatprep.subr.bf16.mxu0 %v3838_v0  ;;  %v1861_v12 = vld [vmem:[#allocation23 + $0x68] sm:$0xff] }
 0x907   :  { %1483 = vst [vmem:[%s4553_s24 + $0x10] sm:$0xff] %v1480_v11  ;;  %v2042_v63 = vld [vmem:[#allocation29 + $0x28] sm:$0xff]  ;;  %s3841_s24 = smov [#allocation32]  }
 0x908   :  { %3162 = vmatpush3.bf16.msra.mxu1 %v3161_v10  ;;  %v3221_v10 = vpack.c.bf16 %v1859_v9, %v1858_v7  ;;  %v2046_v7 = vld [vmem:[#allocation29 + $0x48] sm:$0xff]  ;;  %s2140_s2 = sshll.u32 %s3841_s24, 4  ;;  %s2141_s2 = int_to_ptr.vmem [resolvable:$true] %s2140_s2 }
 0x909   :  { %3163 = vmatprep.subr.bf16.mxu1 %v3838_v0  ;;  %3189 = vmatpush3.bf16.msra.mxu0 %v3188_v58  ;;  %v3242_v58 = vpack.c.bf16 %v1952_v38, %v1951_v35  ;;  %s3747_s7 = scalar_lea.vmem %s2141_s2, 128  ;;  %p3752_p13 = scmp.lt.s32.totalorder %s2141_s2, %s2141_s2 }
 0x90a   :  { %3190 = vmatprep.subr.bf16.mxu0 %v3838_v0  ;;  %p3748_p12 = scmp.ne.s32.totalorder %s2141_s2, %s3747_s7  ;;  %p3753_p0 = scmp.lt.s32.totalorder %s3747_s7, %s3747_s7 }
 0x90c   :  { %3165 = vmatpush3.bf16.msra.mxu1 %v3164_v15  ;;  %p3754_p1 = por %p3753_p0, %p3752_p13 }
 0x90d   :  { %3166 = vmatprep.subr.bf16.mxu1 %v3838_v0  ;;  %3192 = vmatpush3.bf16.msra.mxu0 %v3191_v40  ;;  %v3245_v40 = vpack.c.bf16 %v1954_v37, %v1953_v36 }
 0x90e   :  { %3193 = vmatprep.subr.bf16.mxu0 %v3838_v0  ;;  %p3755_p2 = pnand %p3754_p1, %p3748_p12 }
 0x910   :  { %3168 = vmatpush3.bf16.msra.mxu1 %v3167_v18 }
 0x911   :  { %3169 = vmatprep.subr.bf16.mxu1 %v3838_v0  ;;  %3195 = vmatpush3.bf16.msra.mxu0 %v3194_v44  ;;  %v3248_v44 = vpack.c.bf16 %v1956_v43, %v1955_v42 }
 0x912   :  { %3196 = vmatprep.subr.bf16.mxu0 %v3838_v0 }
 0x914   :  { %3171 = vmatpush3.bf16.msra.mxu1 %v3170_v21 }
 0x915   :  { %3172 = vmatprep.subr.bf16.mxu1 %v3838_v0  ;;  %3198 = vmatpush3.bf16.msra.mxu0 %v3197_v47  ;;  %v3251_v47 = vpack.c.bf16 %v1958_v46, %v1957_v45 }
 0x916   :  { %3199 = vmatprep.subr.bf16.mxu0 %v3838_v0 }
 0x918   :  { %3174 = vmatpush3.bf16.msra.mxu1 %v3173_v24  ;;  %v1944_v24 = vld [vmem:[#allocation26 + $0x8] sm:$0xff] }
 0x919   :  { %3175 = vmatprep.subr.bf16.mxu1 %v3838_v0  ;;  %3201 = vmatpush3.bf16.msra.mxu0 %v3200_v50  ;;  %v3230_v26 = vpack.c.bf16 %v1944_v24, %v1943_v23  ;;  %v3227_v50 = vpack.c.bf16 %v1863_v49, %v1862_v48  ;;  %v2186_v23 = vld [vmem:[#allocation25] ss:$0 sm:$0xff] }
 0x91a   :  { %3202 = vmatprep.subr.bf16.mxu0 %v3838_v0 }
 0x91c   :  { %3177 = vmatpush3.bf16.msra.mxu1 %v3176_v27 }
 0x91d   :  { %3178 = vmatprep.subr.bf16.mxu1 %v3838_v0  ;;  %3204 = vmatpush3.bf16.msra.mxu0 %v3203_v53  ;;  %v2038_v53 = vld [vmem:[#allocation29 + $0x8] sm:$0xff] }
 0x91e   :  { %3229 = vmatprep.subr.bf16.mxu0 %v3838_v0 }
 0x920   :  { %3180 = vmatpush3.bf16.msra.mxu1 %v3179_v30  ;;  %v3233_v30 = vpack.c.bf16 %v1946_v29, %v1945_v28 }
 0x921   :  { %3205 = vmatprep.subr.bf16.mxu1 %v3838_v0 }
 0x923   :  { %2771 = vmatmul.mubr.f32.vlgmr.msra.gmra.mrb[28].mxu1 %v1480_v11  ;;  %v1860_v11 = vld [vmem:[#allocation23 + $0x60] sm:$0xff] }
 0x924   :  { %2840 = vmatprep.mubr.msk.f32.mxu1 %vm3839_vm0, %v3840_v1  ;;  %3207 = vmatpush3.bf16.msra.mxu1 %v3206_v57  ;;  %v3224_v13 = vpack.c.bf16 %v1861_v12, %v1860_v11  ;;  %v3254_v57 = vpack.c.bf16 %v2038_v53, %v2037_v52  ;;  %v2049_v12 = vld [vmem:[#allocation29 + $0x60] sm:$0xff] }
 0x925   :  { %3208 = vmatprep.subr.bf16.mxu1 %v3838_v0 }
 0x928   :  { %3210 = vmatpush3.bf16.msra.mxu1 %v3209_v60  ;;  %v2039_v60 = vld [vmem:[#allocation29 + $0x10] sm:$0xff] }
 0x929   :  { %3211 = vmatprep.subr.bf16.mxu1 %v3838_v0  ;;  %v3257_v62 = vpack.c.bf16 %v2040_v61, %v2039_v60 }
 0x92c   :  { %3213 = vmatpush3.bf16.msra.mxu1 %v3212_v8  ;;  %v2041_v8 = vld [vmem:[#allocation29 + $0x20] sm:$0xff] }
 0x92d   :  { %3214 = vmatprep.subr.bf16.mxu1 %v3838_v0  ;;  %v3260_v2 = vpack.c.bf16 %v2042_v63, %v2041_v8 }
 0x930   :  { %3216 = vmatpush3.bf16.msra.mxu1 %v3215_v3  ;;  %v2043_v3 = vld [vmem:[#allocation29 + $0x30] sm:$0xff] }
 0x931   :  { %3217 = vmatprep.subr.bf16.mxu1 %v3838_v0  ;;  %v3263_v5 = vpack.c.bf16 %v2044_v4, %v2043_v3 }
 0x934   :  { %3219 = vmatpush3.bf16.msra.mxu1 %v3218_v6  ;;  %v2045_v6 = vld [vmem:[#allocation29 + $0x40] sm:$0xff] }
 0x935   :  { %3220 = vmatprep.subr.bf16.mxu1 %v3838_v0  ;;  %v3266_v9 = vpack.c.bf16 %v2046_v7, %v2045_v6 }
 0x938   :  { %3222 = vmatpush3.bf16.msra.mxu1 %v3221_v10  ;;  %v2048_v10 = vld [vmem:[#allocation29 + $0x58] sm:$0xff] }
 0x939   :  { %3223 = vmatprep.subr.bf16.mxu1 %v3838_v0 }
 0x93c   :  { %3225 = vmatpush3.bf16.msra.mxu1 %v3224_v13  ;;  %v2050_v13 = vld [vmem:[#allocation29 + $0x68] sm:$0xff] }
 0x93d   :  { %3226 = vmatprep.subr.bf16.mxu1 %v3838_v0 }
 0x940   :  { %3228 = vmatpush3.bf16.msra.mxu1 %v3227_v50 }
 0x941   :  { %3253 = vmatprep.subr.bf16.mxu1 %v3838_v0 }
 0x9d2   :  { %v1653_v14 = vpop.f32.mrb[28].mxu0 }
 0x9d3   :  { %v2737_v15 = vpop.f32.mrb[29].mxu0 }
 0x9d4   :  { %v2051_v15 = vld [vmem:[#allocation29 + $0x70] sm:$0xff] }
 0x9d6   :  { %v1583_v16 = vpop.f32.mrb[26].mxu1 }
 0x9d7   :  { %v1654_v17 = vadd.f32 %v1653_v14, %v1583_v16  ;;  %v2702_v18 = vpop.f32.mrb[27].mxu1  ;;  %v3272_v14 = vpack.c.bf16 %v2050_v13, %v2049_v12  ;;  %v2052_v16 = vld [vmem:[#allocation29 + $0x78] sm:$0xff] }
 0x9d8   :  { %v3275_v18 = vpack.c.bf16 %v2052_v16, %v2051_v15 }
 0x9f6   :  { %v1740_v19 = vpop.f32.mrb[28].mxu1 }
 0x9f7   :  { %v1744_v21 = vadd.f32 %v1740_v19, %v1654_v17  ;;  %v2772_v22 = vpop.f32.mrb[29].mxu1  ;;  %v2187_v17 = vld [vmem:[#allocation28] ss:$0 sm:$0xff] }
 0x9f9   :  { %v1752_v25 = vadd.f32 %v2184_v20, %v1744_v21 }
 0x9fb   :  { %v1753_v27 = vmax.f32 %v1752_v25, 0.0 }
 0x9fd   :  { %2806 = vmatmul.mubr.f32.vlgmr.msra.gmra.mrb[30].mxu0 %v1753_v27 }
 0x9fe   :  { %3231 = vmatpush3.bf16.msra.mxu0 %v3230_v26  ;;  %2875 = vmatprep.mubr.msk.f32.mxu0 %vm3839_vm0, %v3840_v1 }
 0x9ff   :  { %3232 = vmatprep.subr.bf16.mxu0 %v3838_v0 }
 0xa02   :  { %3234 = vmatpush3.bf16.msra.mxu0 %v3233_v30 }
 0xa03   :  { %3235 = vmatprep.subr.bf16.mxu0 %v3838_v0 }
 0xa06   :  { %3237 = vmatpush3.bf16.msra.mxu0 %v3236_v41 }
 0xa07   :  { %3238 = vmatprep.subr.bf16.mxu0 %v3838_v0 }
 0xa0a   :  { %3240 = vmatpush3.bf16.msra.mxu0 %v3239_v34 }
 0xa0b   :  { %3241 = vmatprep.subr.bf16.mxu0 %v3838_v0 }
 0xa0e   :  { %3243 = vmatpush3.bf16.msra.mxu0 %v3242_v58 }
 0xa0f   :  { %3244 = vmatprep.subr.bf16.mxu0 %v3838_v0 }
 0xa12   :  { %3246 = vmatpush3.bf16.msra.mxu0 %v3245_v40 }
 0xa13   :  { %3247 = vmatprep.subr.bf16.mxu0 %v3838_v0 }
 0xa16   :  { %3249 = vmatpush3.bf16.msra.mxu0 %v3248_v44 }
 0xa17   :  { %3250 = vmatprep.subr.bf16.mxu0 %v3838_v0 }
 0xa1a   :  { %3252 = vmatpush3.bf16.msra.mxu0 %v3251_v47 }
 0xa1d   :  { %2876 = vmatmul.mubr.f32.vlgmr.msra.gmra.mrb[32].mxu0 %v1753_v27 }
 0xad0   :  { %v1843_v54 = vpop.f32.mrb[30].mxu0 }
 0xad1   :  { %v1844_v55 = vadd.f32 %v2185_v51, %v1843_v54  ;;  %v2807_v56 = vpop.f32.mrb[31].mxu0 }
 0xad3   :  { %v1847_v59 = vmax.f32 %v1844_v55, 0.0 }
 0xad5   :  { %2841 = vmatmul.mubr.f32.vlgmr.msra.gmra.mrb[30].mxu1 %v1847_v59 }
 0xad6   :  { %3255 = vmatpush3.bf16.msra.mxu1 %v3254_v57  ;;  %2910 = vmatprep.mubr.msk.f32.mxu1 %vm3839_vm0, %v3840_v1  ;;  %v2047_v1 = vld [vmem:[#allocation29 + $0x50] sm:$0xff] }
 0xad7   :  { %3256 = vmatprep.subr.bf16.mxu1 %v3838_v0  ;;  %v3269_v11 = vpack.c.bf16 %v2048_v10, %v2047_v1 }
 0xada   :  { %3258 = vmatpush3.bf16.msra.mxu1 %v3257_v62 }
 0xadb   :  { %3259 = vmatprep.subr.bf16.mxu1 %v3838_v0 }
 0xade   :  { %3261 = vmatpush3.bf16.msra.mxu1 %v3260_v2 }
 0xadf   :  { %3262 = vmatprep.subr.bf16.mxu1 %v3838_v0 }
 0xae2   :  { %3264 = vmatpush3.bf16.msra.mxu1 %v3263_v5 }
 0xae3   :  { %3265 = vmatprep.subr.bf16.mxu1 %v3838_v0 }
 0xae6   :  { %3267 = vmatpush3.bf16.msra.mxu1 %v3266_v9 }
 0xae7   :  { %3268 = vmatprep.subr.bf16.mxu1 %v3838_v0 }
 0xaea   :  { %3270 = vmatpush3.bf16.msra.mxu1 %v3269_v11 }
 0xaeb   :  { %3271 = vmatprep.subr.bf16.mxu1 %v3838_v0 }
 0xaee   :  { %3273 = vmatpush3.bf16.msra.mxu1 %v3272_v14 }
 0xaef   :  { %3274 = vmatprep.subr.bf16.mxu1 %v3838_v0 }
 0xaf0   :  { %v2032_v19 = vpop.f32.mrb[32].mxu0 }
 0xaf1   :  { %v2033_v20 = vadd.f32 %v2187_v17, %v2032_v19  ;;  %v2877_v21 = vpop.f32.mrb[33].mxu0 }
 0xaf2   :  { %3276 = vmatpush3.bf16.msra.mxu1 %v3275_v18 }
 0xaf3   :  { %v2036_v22 = vmax.f32 %v2033_v20, 0.0 }
 0xaf5   :  { %2911 = vmatmul.mubr.f32.vlgmr.msra.gmra.mrb[32].mxu1 %v2036_v22 }
 0xba8   :  { %v1937_v24 = vpop.f32.mrb[30].mxu1 }
 0xba9   :  { %v1938_v25 = vadd.f32 %v2186_v23, %v1937_v24  ;;  %v2842_v26 = vpop.f32.mrb[31].mxu1 }
 0xbab   :  { %v1941_v27 = vmax.f32 %v1938_v25, 0.0 }
 0xbad   :  { %1942 = vst [vmem:[#allocation32] sm:$0xff] %v1941_v27 }
 0xbae   :  { %3758 = shalt.err (!%p3755_p2)
}
 0xbaf   :  { %s4595_s27 = sld [smem:[#allocation58_spill]] }
 0xbb5   :  { %s3759_s30 = scalar_lea.hbm %s4595_s27, 128 }
 0xbb6   :  { %p3760_p3 = scmp.ne.s32.totalorder %s4595_s27, %s3759_s30  ;;  %p3763_p4 = scmp.lt.u32.totalorder %s3759_s30, %s4595_s27 }
 0xbb8   :  { %p3765_p5 = pnand %p3763_p4, %p3760_p3 }
 0xbba   :  { %3768 = shalt.err (!%p3765_p5)
}
 0xbbb   :  { %2143 = dma.vmem_to_hbm [thread:$0]  %s2141_s2, 128, %s4595_s27, [#allocation4]   ;;  %v2188_v0 = vld [vmem:[#allocation31] ss:$0 sm:$0xff] }
 0xbbc   :  { %s3842_s8 = smov [#allocation33]  }
 0xbbd   :  { %s2150_s6 = sshll.u32 %s3842_s8, 4  ;;  %s2151_s6 = int_to_ptr.vmem [resolvable:$true] %s2150_s6 }
 0xbbe   :  { %s3769_s22 = scalar_lea.vmem %s2151_s6, 128  ;;  %p3774_p7 = scmp.lt.s32.totalorder %s2151_s6, %s2151_s6 }
 0xbbf   :  { %p3770_p6 = scmp.ne.s32.totalorder %s2151_s6, %s3769_s22  ;;  %p3775_p8 = scmp.lt.s32.totalorder %s3769_s22, %s3769_s22 }
 0xbc1   :  { %p3776_p9 = por %p3775_p8, %p3774_p7 }
 0xbc3   :  { %p3777_p10 = pnand %p3776_p9, %p3770_p6 }
 0xbc8   :  { %v2126_v28 = vpop.f32.mrb[32].mxu1 }
 0xbc9   :  { %v2127_v29 = vadd.f32 %v2188_v0, %v2126_v28  ;;  %v2912_v30 = vpop.f32.mrb[33].mxu1 }
 0xbcb   :  { %v2130_v31 = vmax.f32 %v2127_v29, 0.0 }
 0xbcd   :  { %2131 = vst [vmem:[#allocation33] sm:$0xff] %v2130_v31 }
 0xbce   :  { %3780 = shalt.err (!%p3777_p10)
}
 0xbcf   :  { %s4596_s1 = sld [smem:[#allocation59_spill]] }
 0xbd5   :  { %s3781_s0 = scalar_lea.hbm %s4596_s1, 128 }
 0xbd6   :  { %p3782_p11 = scmp.ne.s32.totalorder %s4596_s1, %s3781_s0  ;;  %p3785_p12 = scmp.lt.u32.totalorder %s3781_s0, %s4596_s1 }
 0xbd8   :  { %p3787_p13 = pnand %p3785_p12, %p3782_p11 }
 0xbda   :  { %3790 = shalt.err (!%p3787_p13)
}
 0xbdb   :  { %2153 = dma.vmem_to_hbm [thread:$0]  %s2151_s6, 128, %s4596_s1, [#allocation34]  }
 0xbdc   :  { %3811 = dma.done.wait [#allocation4], 128  }
 0xbdd   :  { %3812 = vsyncadd [#allocation4], 4294967168 }
 0xbde   :  { %3813 = dma.done.wait [#allocation34], 128  }
 0xbdf   :  { %3814 = vsyncadd [#allocation34], 4294967168 }
 0xbe0   :  { %2162 = vsyncpa [#allocation3], 1 }
 0xbe1   :  { %2163 = vsyncpa [#allocation6], 1 }
 0xbe2   :  { %2164 = vsyncpa [#allocation9], 1 }
 0xbe3   :  { %2165 = vsyncpa [#allocation12], 1 }
 0xbe4   :  { %2166 = vsyncpa [#allocation15], 1 }
 0xbe5   :  { %2167 = vsyncpa [#allocation18], 1 }
 0xbe6   :  { %2168 = vsyncpa [#allocation21], 1 }
 0xbe7   :  { %2169 = vsyncpa [#allocation24], 1 }
 0xbe8   :  { %2170 = vsyncpa [#allocation27], 1 }
 0xbe9   :  { %2171 = vsyncpa [#allocation30], 1 }
 0xbea   :  { %2172 = vsyncpa [#allocation4], 1 }
 0xbeb   :  { %2173 = vsyncpa [#allocation34], 1 }

</bundles_post_ra>
